<compile_context>
chip_gen: v7x
topology: tpu7x:2x2x1
jax: 0.10.0
libtpu: 0.0.40
codegen_flags: <defaults>
</compile_context>

<pallas_src>
import functools

import jax
import jax.numpy as jnp
from jax import lax
from jax.experimental import pallas as pl
from jax.experimental.pallas import tpu as pltpu


# ----------------------------------------------------------------------------
# Shared in-kernel helpers
# ----------------------------------------------------------------------------
def _softmax_lastdim(dots):
    """Stable softmax over the last axis (f32). EUP reciprocal + 1 Newton step."""
    m = jnp.max(dots, axis=-1, keepdims=True)
    e = jnp.exp(dots - m)
    s = jnp.sum(e, axis=-1, keepdims=True)
    r = pl.reciprocal(s, approx=True)      # EUP slot, nearly free next to MXU/VPU work
    r = r * (2.0 - s * r)                  # one Newton step -> ~f32 accuracy
    return e * r


# ----------------------------------------------------------------------------
# Path 1: tiny shapes — grid=(), batch folded into the projection rows.
# ----------------------------------------------------------------------------
def _fold_batch_kernel(
    q_ref, k_ref, v_ref,            # (B*L, d_model), (B*S, d_model), (B*S, d_model)
    wq_ref, bq_ref,                 # (H, d_model, dk) / (H, 1, dk)   [scale folded in]
    wk_ref, bk_ref,                 # (H, d_model, dk) / (H, 1, dk)
    wv_ref, bv_ref,                 # (H, d_model, dv) / (H, 1, dv)
    wo_ref, bo_ref,                 # (H, dv, d_model) / (1, d_model)
    out_ref, attn_ref,              # (B, L, d_model), (B, H, L, S)
    *, batch, seq_q, seq_kv, n_heads, mxu_dtype,
):
    mx = lambda a: a.astype(mxu_dtype)
    xq = mx(q_ref[...])
    xk = mx(k_ref[...])
    xv = mx(v_ref[...])

    # Per-head projections over the folded batch: one matmul per head/tensor,
    # full B*L / B*S row occupancy, no lane-axis head slicing afterwards.
    q_heads, k_heads, v_heads = [], [], []
    for h in range(n_heads):
        q_heads.append(jnp.dot(xq, wq_ref[h], preferred_element_type=jnp.float32) + bq_ref[h])
        k_heads.append(jnp.dot(xk, wk_ref[h], preferred_element_type=jnp.float32) + bk_ref[h])
        v_heads.append(jnp.dot(xv, wv_ref[h], preferred_element_type=jnp.float32) + bv_ref[h])

    contract_last = (((1,), (1,)), ((), ()))   # contract last dims (q @ k^T), no batch dims
    bo = bo_ref[...]
    for b in range(batch):                     # static python loop, B is tiny on this path
        probs = []
        acc = None
        for h in range(n_heads):
            qh = q_heads[h][b * seq_q:(b + 1) * seq_q]     # (L, dk)  sublane-aligned slice
            kh = k_heads[h][b * seq_kv:(b + 1) * seq_kv]   # (S, dk)
            vh = v_heads[h][b * seq_kv:(b + 1) * seq_kv]   # (S, dv)

            dots = lax.dot_general(mx(qh), mx(kh), contract_last,
                                   preferred_element_type=jnp.float32)   # (L, S)
            p = _softmax_lastdim(dots)          # dropout(p=0) is identity -> no-op
            probs.append(p)

            ctx = jnp.dot(mx(p), mx(vh), preferred_element_type=jnp.float32)       # (L, dv)
            contrib = jnp.dot(mx(ctx), wo_ref[h], preferred_element_type=jnp.float32)
            acc = contrib if acc is None else acc + contrib

        attn_ref[b] = jnp.stack(probs, axis=0)   # (H, L, S): single lane-dense store
        out_ref[b] = acc + bo


# ----------------------------------------------------------------------------
# Path 2: production shapes — grid=(B, L_tiles), both axes parallel.
# ----------------------------------------------------------------------------
def _grid_kernel(
    q_ref, k_ref, v_ref,            # (tL, d_model), (S, d_model), (S, d_model)
    wq_ref, bq_ref, wk_ref, bk_ref, wv_ref, bv_ref, wo_ref, bo_ref,
    out_ref, attn_ref,              # (tL, d_model), (H, tL, S)
    *, n_heads, mxu_dtype,
):
    mx = lambda a: a.astype(mxu_dtype)
    xq = mx(q_ref[...])
    xk = mx(k_ref[...])
    xv = mx(v_ref[...])
    contract_last = (((1,), (1,)), ((), ()))

    probs = []
    acc = None
    for h in range(n_heads):
        # NOTE: K/V projections are recomputed per L-tile when L_tiles > 1; for
        # the shapes that force L tiling they are a small fraction of QK^T/PV.
        qh = jnp.dot(xq, wq_ref[h], preferred_element_type=jnp.float32) + bq_ref[h]
        kh = jnp.dot(xk, wk_ref[h], preferred_element_type=jnp.float32) + bk_ref[h]
        vh = jnp.dot(xv, wv_ref[h], preferred_element_type=jnp.float32) + bv_ref[h]

        dots = lax.dot_general(mx(qh), mx(kh), contract_last,
                               preferred_element_type=jnp.float32)        # (tL, S)
        p = _softmax_lastdim(dots)
        probs.append(p)

        ctx = jnp.dot(mx(p), mx(vh), preferred_element_type=jnp.float32)  # (tL, dv)
        contrib = jnp.dot(mx(ctx), wo_ref[h], preferred_element_type=jnp.float32)
        acc = contrib if acc is None else acc + contrib

    attn_ref[...] = jnp.stack(probs, axis=0)   # (H, tL, S): single store
    out_ref[...] = acc + bo_ref[...]


# ----------------------------------------------------------------------------
# Wrapper
# ----------------------------------------------------------------------------
def _weight_norm_effective(v, g):
    # PyTorch nn.utils.weight_norm (dim=0): w = g * v / ||v||_row.
    norm = jnp.sqrt(jnp.sum(v * v, axis=1, keepdims=True))
    return g * v / norm


def _split_heads_in_out(w, n_heads):
    """PyTorch-layout (H*dh, d_in) weight -> (H, d_in, dh) blocks for x @ W."""
    out_f, in_f = w.shape
    dh = out_f // n_heads
    return w.reshape(n_heads, dh, in_f).transpose(0, 2, 1)


def _pick_query_tile(L, max_tile=256):
    """Largest multiple-of-8 divisor of L that is <= max_tile, else full L."""
    if L <= max_tile:
        return L
    for t in range(max_tile, 7, -8):
        if L % t == 0:
            return t
    return L


def _fold_vmem_bytes(B, L, S, d_model, H, dk, dv):
    """Rough f32 VMEM footprint of the fold-batch path (with temp slack)."""
    acts = B * (L + 2 * S) * d_model
    proj = B * (L * H * dk + S * H * (dk + dv))
    attn = B * H * L * S
    outs = B * L * d_model
    wts = d_model * H * (2 * dk + dv) + H * dv * d_model
    return 4 * (acts + proj + 2 * attn + outs + wts)


def channel_autocorrelation_forward(params, queries, keys, values, n_heads,
                                    impl="auto", mxu_dtype=jnp.float32):
    """channel_AutoCorrelationLayer.forward (mask unused, dropout=0).

    Returns (out, attn) matching the PyTorch module for 2-D or 3-D inputs.
    """
    squeeze_batch = queries.ndim == 2
    if squeeze_batch:
        queries, keys, values = queries[None], keys[None], values[None]

    B, L, d_model = queries.shape
    S = keys.shape[1]
    H = n_heads

    # -------- parameter setup (not hot path) ------------------------------
    wq = _weight_norm_effective(params["q_v"], params["q_g"])
    wk = _weight_norm_effective(params["k_v"], params["k_g"])
    wv = _weight_norm_effective(params["v_v"], params["v_g"])
    wo = _weight_norm_effective(params["o_v"], params["o_g"])

    d_keys = wq.shape[0] // H
    d_values = wv.shape[0] // H
    scale = float(d_keys) ** (-0.5)

    # Per-head (in, out) weight blocks; softmax scale folded into Q weight+bias.
    wq_h = (_split_heads_in_out(wq, H) * scale).astype(mxu_dtype)   # (H, d_model, dk)
    wk_h = _split_heads_in_out(wk, H).astype(mxu_dtype)             # (H, d_model, dk)
    wv_h = _split_heads_in_out(wv, H).astype(mxu_dtype)             # (H, d_model, dv)
    wo_h = wo.T.reshape(H, d_values, d_model).astype(mxu_dtype)     # (H, dv, d_model)

    bq_h = (params["q_b"] * scale).reshape(H, 1, d_keys).astype(jnp.float32)
    bk_h = params["k_b"].reshape(H, 1, d_keys).astype(jnp.float32)
    bv_h = params["v_b"].reshape(H, 1, d_values).astype(jnp.float32)
    bo = params["o_b"].reshape(1, d_model).astype(jnp.float32)

    weight_args = (wq_h, bq_h, wk_h, bk_h, wv_h, bv_h, wo_h, bo)

    if impl == "auto":
        # Tiny problems: fold batch (kills per-grid-step overhead on 1-TC chips).
        # Bigger problems: (B, L-tile) parallel grid keeps per-step blocks inside
        # VMEM (notably v7x's 64 MiB) and feeds both v7x TensorCores.
        impl = ("fold_batch"
                if _fold_vmem_bytes(B, L, S, d_model, H, d_keys, d_values) < (16 << 20)
                else "grid")

    out_shapes = (jax.ShapeDtypeStruct((B, L, d_model), jnp.float32),
                  jax.ShapeDtypeStruct((B, H, L, S), jnp.float32))

    if impl == "fold_batch":
        kernel = functools.partial(
            _fold_batch_kernel, batch=B, seq_q=L, seq_kv=S, n_heads=H,
            mxu_dtype=mxu_dtype)
        out, attn = pl.pallas_call(kernel, out_shape=out_shapes)(
            queries.reshape(B * L, d_model),     # free reshape in HBM
            keys.reshape(B * S, d_model),
            values.reshape(B * S, d_model),
            *weight_args)
    elif impl == "grid":
        tL = _pick_query_tile(L)
        full3 = lambda b, l: (0, 0, 0)
        full2 = lambda b, l: (0, 0)
        kernel = functools.partial(_grid_kernel, n_heads=H, mxu_dtype=mxu_dtype)
        out, attn = pl.pallas_call(
            kernel,
            grid=(B, L // tL),
            in_specs=[
                pl.BlockSpec((None, tL, d_model), lambda b, l: (b, l, 0)),
                pl.BlockSpec((None, S, d_model), lambda b, l: (b, 0, 0)),
                pl.BlockSpec((None, S, d_model), lambda b, l: (b, 0, 0)),
                # Constant-index weight/bias blocks, held resident across steps.
                pl.BlockSpec((H, d_model, d_keys), full3),
                pl.BlockSpec((H, 1, d_keys), full3),
                pl.BlockSpec((H, d_model, d_keys), full3),
                pl.BlockSpec((H, 1, d_keys), full3),
                pl.BlockSpec((H, d_model, d_values), full3),
                pl.BlockSpec((H, 1, d_values), full3),
                pl.BlockSpec((H, d_values, d_model), full3),
                pl.BlockSpec((1, d_model), full2),
            ],
            out_specs=[
                pl.BlockSpec((None, tL, d_model), lambda b, l: (b, l, 0)),
                pl.BlockSpec((None, H, tL, S), lambda b, l: (b, 0, l, 0)),
            ],
            out_shape=out_shapes,
            compiler_params=pltpu.CompilerParams(
                dimension_semantics=("parallel", "parallel")),
        )(queries, keys, values, *weight_args)
    else:
        raise ValueError(f"unknown impl: {impl!r}")

    if squeeze_batch:
        return out[0], attn[0]
    return out, attn


# ----------------------------------------------------------------------------
# Pure-JAX reference (for correctness check)
# ----------------------------------------------------------------------------
def reference_forward(params, queries, keys, values, n_heads):
    squeeze_batch = queries.ndim == 2
    if squeeze_batch:
        queries, keys, values = queries[None], keys[None], values[None]
    B, L, d_model = queries.shape
    S = keys.shape[1]
    H = n_heads
    wq = _weight_norm_effective(params["q_v"], params["q_g"])
    wk = _weight_norm_effective(params["k_v"], params["k_g"])
    wv = _weight_norm_effective(params["v_v"], params["v_g"])
    wo = _weight_norm_effective(params["o_v"], params["o_g"])
    d_keys = wq.shape[0] // H
    d_values = wv.shape[0] // H
    scale = float(d_keys) ** (-0.5)
    q = (queries @ wq.T + params["q_b"]).reshape(B, L, H, d_keys).transpose(0, 2, 1, 3)
    k = (keys @ wk.T + params["k_b"]).reshape(B, S, H, d_keys).transpose(0, 2, 1, 3)
    v = (values @ wv.T + params["v_b"]).reshape(B, S, H, d_values).transpose(0, 2, 1, 3)
    dots = jnp.einsum("bhld,bhsd->bhls", q, k) * scale
    attn = jax.nn.softmax(dots, axis=-1)
    out = jnp.einsum("bhls,bhsd->bhld", attn, v)
    out = out.transpose(0, 2, 1, 3).reshape(B, L, H * d_values)
    out = out @ wo.T + params["o_b"]
    if squeeze_batch:
        return out[0], attn[0]
    return out, attn


# ----------------------------------------------------------------------------
# Main
# ----------------------------------------------------------------------------
if __name__ == "__main__":
    d_model = 32
    n_heads = 4
    d_keys = d_model // n_heads      # 8
    d_values = d_model // n_heads    # 8
    B, L, S = 2, 8, 8

    key = jax.random.PRNGKey(0)
    ks = jax.random.split(key, 16)

    def init_linear(kv, kb, out_f, in_f):
        v = jax.random.normal(kv, (out_f, in_f), jnp.float32) * 0.1
        g = jnp.sqrt(jnp.sum(v * v, axis=1, keepdims=True))  # weight_norm init: g = ||v||
        b = jax.random.normal(kb, (out_f,), jnp.float32) * 0.01
        return v, g, b

    q_v, q_g, q_b = init_linear(ks[0], ks[1], d_keys * n_heads, d_model)
    k_v, k_g, k_b = init_linear(ks[2], ks[3], d_keys * n_heads, d_model)
    v_v, v_g, v_b = init_linear(ks[4], ks[5], d_values * n_heads, d_model)
    o_v, o_g, o_b = init_linear(ks[6], ks[7], d_model, d_values * n_heads)

    params = dict(
        q_v=q_v, q_g=q_g, q_b=q_b,
        k_v=k_v, k_g=k_g, k_b=k_b,
        v_v=v_v, v_g=v_g, v_b=v_b,
        o_v=o_v, o_g=o_g, o_b=o_b,
    )

    queries = jax.random.normal(ks[8], (B, L, d_model), jnp.float32)
    keys_in = jax.random.normal(ks[9], (B, S, d_model), jnp.float32)
    values_in = jax.random.normal(ks[10], (B, S, d_model), jnp.float32)

    ref_out, ref_attn = reference_forward(params, queries, keys_in, values_in, n_heads)

    # 1) auto -> fold_batch path (tiny shapes: no per-grid-step overhead).
    out, attn = channel_autocorrelation_forward(params, queries, keys_in, values_in, n_heads)
    out = jax.block_until_ready(out)
    attn = jax.block_until_ready(attn)
    assert out.shape == (B, L, d_model)
    assert attn.shape == (B, n_heads, L, S)
    assert jnp.allclose(out, ref_out, atol=1e-5, rtol=1e-5)
    assert jnp.allclose(attn, ref_attn, atol=1e-5, rtol=1e-5)

    # 2) explicit grid path (production / v7x megacore path) on the same inputs.
    out_g, attn_g = channel_autocorrelation_forward(
        params, queries, keys_in, values_in, n_heads, impl="grid")
    out_g = jax.block_until_ready(out_g)
    assert jnp.allclose(out_g, ref_out, atol=1e-5, rtol=1e-5)
    assert jnp.allclose(attn_g, ref_attn, atol=1e-5, rtol=1e-5)

    # 3) 2-D (no-batch) input variant of the module forward.
    out2, attn2 = channel_autocorrelation_forward(
        params, queries[0], keys_in[0], values_in[0], n_heads)
    out2 = jax.block_until_ready(out2)
    ref_out2, ref_attn2 = reference_forward(params, queries[0], keys_in[0], values_in[0], n_heads)
    assert out2.shape == (L, d_model) and attn2.shape == (n_heads, L, S)
    assert jnp.allclose(out2, ref_out2, atol=1e-5, rtol=1e-5)
    assert jnp.allclose(attn2, ref_attn2, atol=1e-5, rtol=1e-5)

    # 4) bf16 MXU operands (production option, ~3x MXU throughput); looser check.
    out_bf, attn_bf = channel_autocorrelation_forward(
        params, queries, keys_in, values_in, n_heads, mxu_dtype=jnp.bfloat16)
    out_bf = jax.block_until_ready(out_bf)
    assert jnp.allclose(out_bf, ref_out, atol=5e-2, rtol=5e-2)
    assert jnp.allclose(attn_bf, ref_attn, atol=5e-2, rtol=5e-2)

    print("KERNEL_OK")
</pallas_src>

<mosaic_0001>
module attributes {stable_mosaic.version = 11 : i64} {
  func.func @_fold_batch_kernel(%arg0: memref<16x32xf32, #tpu.memory_space<vmem>>, %arg1: memref<16x32xf32, #tpu.memory_space<vmem>>, %arg2: memref<16x32xf32, #tpu.memory_space<vmem>>, %arg3: memref<4x32x8xf32, #tpu.memory_space<vmem>>, %arg4: memref<4x1x8xf32, #tpu.memory_space<vmem>>, %arg5: memref<4x32x8xf32, #tpu.memory_space<vmem>>, %arg6: memref<4x1x8xf32, #tpu.memory_space<vmem>>, %arg7: memref<4x32x8xf32, #tpu.memory_space<vmem>>, %arg8: memref<4x1x8xf32, #tpu.memory_space<vmem>>, %arg9: memref<4x8x32xf32, #tpu.memory_space<vmem>>, %arg10: memref<1x32xf32, #tpu.memory_space<vmem>>, %arg11: memref<2x8x32xf32, #tpu.memory_space<vmem>>, %arg12: memref<2x4x8x8xf32, #tpu.memory_space<vmem>>) attributes {dimension_semantics = [], scalar_prefetch = 0 : i64, scratch_operands = 0 : i64, tpu.core_type = #tpu.core_type<tc>} {
    %c0 = arith.constant 0 : index
    %c0_0 = arith.constant 0 : index
    %0 = vector.load %arg0[%c0, %c0_0] : memref<16x32xf32, #tpu.memory_space<vmem>>, vector<16x32xf32>
    %c0_1 = arith.constant 0 : index
    %c0_2 = arith.constant 0 : index
    %1 = vector.load %arg1[%c0_1, %c0_2] : memref<16x32xf32, #tpu.memory_space<vmem>>, vector<16x32xf32>
    %c0_3 = arith.constant 0 : index
    %c0_4 = arith.constant 0 : index
    %2 = vector.load %arg2[%c0_3, %c0_4] : memref<16x32xf32, #tpu.memory_space<vmem>>, vector<16x32xf32>
    %c0_5 = arith.constant 0 : index
    %c0_6 = arith.constant 0 : index
    %c0_7 = arith.constant 0 : index
    %3 = vector.load %arg3[%c0_5, %c0_6, %c0_7] : memref<4x32x8xf32, #tpu.memory_space<vmem>>, vector<1x32x8xf32>
    %4 = vector.shape_cast %3 : vector<1x32x8xf32> to vector<32x8xf32>
    %cst = arith.constant dense<0.000000e+00> : vector<16x8xf32>
    %5 = tpu.matmul %0, %4, %cst {dimension_numbers = #tpu.dot_dimension_numbers<[1], [0], [0], [1], [0, 0, 1, 1], [], []>} : vector<16x32xf32>, vector<32x8xf32>, vector<16x8xf32> -> vector<16x8xf32>
    %c0_8 = arith.constant 0 : index
    %c0_9 = arith.constant 0 : index
    %c0_10 = arith.constant 0 : index
    %6 = vector.load %arg4[%c0_8, %c0_9, %c0_10] : memref<4x1x8xf32, #tpu.memory_space<vmem>>, vector<1x1x8xf32>
    %7 = vector.shape_cast %6 : vector<1x1x8xf32> to vector<1x8xf32>
    %8 = vector.broadcast %7 : vector<1x8xf32> to vector<16x8xf32>
    %9 = arith.addf %5, %8 : vector<16x8xf32>
    %c0_11 = arith.constant 0 : index
    %c0_12 = arith.constant 0 : index
    %c0_13 = arith.constant 0 : index
    %10 = vector.load %arg5[%c0_11, %c0_12, %c0_13] : memref<4x32x8xf32, #tpu.memory_space<vmem>>, vector<1x32x8xf32>
    %11 = vector.shape_cast %10 : vector<1x32x8xf32> to vector<32x8xf32>
    %cst_14 = arith.constant dense<0.000000e+00> : vector<16x8xf32>
    %12 = tpu.matmul %1, %11, %cst_14 {dimension_numbers = #tpu.dot_dimension_numbers<[1], [0], [0], [1], [0, 0, 1, 1], [], []>} : vector<16x32xf32>, vector<32x8xf32>, vector<16x8xf32> -> vector<16x8xf32>
    %c0_15 = arith.constant 0 : index
    %c0_16 = arith.constant 0 : index
    %c0_17 = arith.constant 0 : index
    %13 = vector.load %arg6[%c0_15, %c0_16, %c0_17] : memref<4x1x8xf32, #tpu.memory_space<vmem>>, vector<1x1x8xf32>
    %14 = vector.shape_cast %13 : vector<1x1x8xf32> to vector<1x8xf32>
    %15 = vector.broadcast %14 : vector<1x8xf32> to vector<16x8xf32>
    %16 = arith.addf %12, %15 : vector<16x8xf32>
    %c0_18 = arith.constant 0 : index
    %c0_19 = arith.constant 0 : index
    %c0_20 = arith.constant 0 : index
    %17 = vector.load %arg7[%c0_18, %c0_19, %c0_20] : memref<4x32x8xf32, #tpu.memory_space<vmem>>, vector<1x32x8xf32>
    %18 = vector.shape_cast %17 : vector<1x32x8xf32> to vector<32x8xf32>
    %cst_21 = arith.constant dense<0.000000e+00> : vector<16x8xf32>
    %19 = tpu.matmul %2, %18, %cst_21 {dimension_numbers = #tpu.dot_dimension_numbers<[1], [0], [0], [1], [0, 0, 1, 1], [], []>} : vector<16x32xf32>, vector<32x8xf32>, vector<16x8xf32> -> vector<16x8xf32>
    %c0_22 = arith.constant 0 : index
    %c0_23 = arith.constant 0 : index
    %c0_24 = arith.constant 0 : index
    %20 = vector.load %arg8[%c0_22, %c0_23, %c0_24] : memref<4x1x8xf32, #tpu.memory_space<vmem>>, vector<1x1x8xf32>
    %21 = vector.shape_cast %20 : vector<1x1x8xf32> to vector<1x8xf32>
    %22 = vector.broadcast %21 : vector<1x8xf32> to vector<16x8xf32>
    %23 = arith.addf %19, %22 : vector<16x8xf32>
    %c1 = arith.constant 1 : index
    %c0_25 = arith.constant 0 : index
    %c0_26 = arith.constant 0 : index
    %24 = vector.load %arg3[%c1, %c0_25, %c0_26] : memref<4x32x8xf32, #tpu.memory_space<vmem>>, vector<1x32x8xf32>
    %25 = vector.shape_cast %24 : vector<1x32x8xf32> to vector<32x8xf32>
    %cst_27 = arith.constant dense<0.000000e+00> : vector<16x8xf32>
    %26 = tpu.matmul %0, %25, %cst_27 {dimension_numbers = #tpu.dot_dimension_numbers<[1], [0], [0], [1], [0, 0, 1, 1], [], []>} : vector<16x32xf32>, vector<32x8xf32>, vector<16x8xf32> -> vector<16x8xf32>
    %c1_28 = arith.constant 1 : index
    %c0_29 = arith.constant 0 : index
    %c0_30 = arith.constant 0 : index
    %27 = vector.load %arg4[%c1_28, %c0_29, %c0_30] : memref<4x1x8xf32, #tpu.memory_space<vmem>>, vector<1x1x8xf32>
    %28 = vector.shape_cast %27 : vector<1x1x8xf32> to vector<1x8xf32>
    %29 = vector.broadcast %28 : vector<1x8xf32> to vector<16x8xf32>
    %30 = arith.addf %26, %29 : vector<16x8xf32>
    %c1_31 = arith.constant 1 : index
    %c0_32 = arith.constant 0 : index
    %c0_33 = arith.constant 0 : index
    %31 = vector.load %arg5[%c1_31, %c0_32, %c0_33] : memref<4x32x8xf32, #tpu.memory_space<vmem>>, vector<1x32x8xf32>
    %32 = vector.shape_cast %31 : vector<1x32x8xf32> to vector<32x8xf32>
    %cst_34 = arith.constant dense<0.000000e+00> : vector<16x8xf32>
    %33 = tpu.matmul %1, %32, %cst_34 {dimension_numbers = #tpu.dot_dimension_numbers<[1], [0], [0], [1], [0, 0, 1, 1], [], []>} : vector<16x32xf32>, vector<32x8xf32>, vector<16x8xf32> -> vector<16x8xf32>
    %c1_35 = arith.constant 1 : index
    %c0_36 = arith.constant 0 : index
    %c0_37 = arith.constant 0 : index
    %34 = vector.load %arg6[%c1_35, %c0_36, %c0_37] : memref<4x1x8xf32, #tpu.memory_space<vmem>>, vector<1x1x8xf32>
    %35 = vector.shape_cast %34 : vector<1x1x8xf32> to vector<1x8xf32>
    %36 = vector.broadcast %35 : vector<1x8xf32> to vector<16x8xf32>
    %37 = arith.addf %33, %36 : vector<16x8xf32>
    %c1_38 = arith.constant 1 : index
    %c0_39 = arith.constant 0 : index
    %c0_40 = arith.constant 0 : index
    %38 = vector.load %arg7[%c1_38, %c0_39, %c0_40] : memref<4x32x8xf32, #tpu.memory_space<vmem>>, vector<1x32x8xf32>
    %39 = vector.shape_cast %38 : vector<1x32x8xf32> to vector<32x8xf32>
    %cst_41 = arith.constant dense<0.000000e+00> : vector<16x8xf32>
    %40 = tpu.matmul %2, %39, %cst_41 {dimension_numbers = #tpu.dot_dimension_numbers<[1], [0], [0], [1], [0, 0, 1, 1], [], []>} : vector<16x32xf32>, vector<32x8xf32>, vector<16x8xf32> -> vector<16x8xf32>
    %c1_42 = arith.constant 1 : index
    %c0_43 = arith.constant 0 : index
    %c0_44 = arith.constant 0 : index
    %41 = vector.load %arg8[%c1_42, %c0_43, %c0_44] : memref<4x1x8xf32, #tpu.memory_space<vmem>>, vector<1x1x8xf32>
    %42 = vector.shape_cast %41 : vector<1x1x8xf32> to vector<1x8xf32>
    %43 = vector.broadcast %42 : vector<1x8xf32> to vector<16x8xf32>
    %44 = arith.addf %40, %43 : vector<16x8xf32>
    %c2 = arith.constant 2 : index
    %c0_45 = arith.constant 0 : index
    %c0_46 = arith.constant 0 : index
    %45 = vector.load %arg3[%c2, %c0_45, %c0_46] : memref<4x32x8xf32, #tpu.memory_space<vmem>>, vector<1x32x8xf32>
    %46 = vector.shape_cast %45 : vector<1x32x8xf32> to vector<32x8xf32>
    %cst_47 = arith.constant dense<0.000000e+00> : vector<16x8xf32>
    %47 = tpu.matmul %0, %46, %cst_47 {dimension_numbers = #tpu.dot_dimension_numbers<[1], [0], [0], [1], [0, 0, 1, 1], [], []>} : vector<16x32xf32>, vector<32x8xf32>, vector<16x8xf32> -> vector<16x8xf32>
    %c2_48 = arith.constant 2 : index
    %c0_49 = arith.constant 0 : index
    %c0_50 = arith.constant 0 : index
    %48 = vector.load %arg4[%c2_48, %c0_49, %c0_50] : memref<4x1x8xf32, #tpu.memory_space<vmem>>, vector<1x1x8xf32>
    %49 = vector.shape_cast %48 : vector<1x1x8xf32> to vector<1x8xf32>
    %50 = vector.broadcast %49 : vector<1x8xf32> to vector<16x8xf32>
    %51 = arith.addf %47, %50 : vector<16x8xf32>
    %c2_51 = arith.constant 2 : index
    %c0_52 = arith.constant 0 : index
    %c0_53 = arith.constant 0 : index
    %52 = vector.load %arg5[%c2_51, %c0_52, %c0_53] : memref<4x32x8xf32, #tpu.memory_space<vmem>>, vector<1x32x8xf32>
    %53 = vector.shape_cast %52 : vector<1x32x8xf32> to vector<32x8xf32>
    %cst_54 = arith.constant dense<0.000000e+00> : vector<16x8xf32>
    %54 = tpu.matmul %1, %53, %cst_54 {dimension_numbers = #tpu.dot_dimension_numbers<[1], [0], [0], [1], [0, 0, 1, 1], [], []>} : vector<16x32xf32>, vector<32x8xf32>, vector<16x8xf32> -> vector<16x8xf32>
    %c2_55 = arith.constant 2 : index
    %c0_56 = arith.constant 0 : index
    %c0_57 = arith.constant 0 : index
    %55 = vector.load %arg6[%c2_55, %c0_56, %c0_57] : memref<4x1x8xf32, #tpu.memory_space<vmem>>, vector<1x1x8xf32>
    %56 = vector.shape_cast %55 : vector<1x1x8xf32> to vector<1x8xf32>
    %57 = vector.broadcast %56 : vector<1x8xf32> to vector<16x8xf32>
    %58 = arith.addf %54, %57 : vector<16x8xf32>
    %c2_58 = arith.constant 2 : index
    %c0_59 = arith.constant 0 : index
    %c0_60 = arith.constant 0 : index
    %59 = vector.load %arg7[%c2_58, %c0_59, %c0_60] : memref<4x32x8xf32, #tpu.memory_space<vmem>>, vector<1x32x8xf32>
    %60 = vector.shape_cast %59 : vector<1x32x8xf32> to vector<32x8xf32>
    %cst_61 = arith.constant dense<0.000000e+00> : vector<16x8xf32>
    %61 = tpu.matmul %2, %60, %cst_61 {dimension_numbers = #tpu.dot_dimension_numbers<[1], [0], [0], [1], [0, 0, 1, 1], [], []>} : vector<16x32xf32>, vector<32x8xf32>, vector<16x8xf32> -> vector<16x8xf32>
    %c2_62 = arith.constant 2 : index
    %c0_63 = arith.constant 0 : index
    %c0_64 = arith.constant 0 : index
    %62 = vector.load %arg8[%c2_62, %c0_63, %c0_64] : memref<4x1x8xf32, #tpu.memory_space<vmem>>, vector<1x1x8xf32>
    %63 = vector.shape_cast %62 : vector<1x1x8xf32> to vector<1x8xf32>
    %64 = vector.broadcast %63 : vector<1x8xf32> to vector<16x8xf32>
    %65 = arith.addf %61, %64 : vector<16x8xf32>
    %c3 = arith.constant 3 : index
    %c0_65 = arith.constant 0 : index
    %c0_66 = arith.constant 0 : index
    %66 = vector.load %arg3[%c3, %c0_65, %c0_66] : memref<4x32x8xf32, #tpu.memory_space<vmem>>, vector<1x32x8xf32>
    %67 = vector.shape_cast %66 : vector<1x32x8xf32> to vector<32x8xf32>
    %cst_67 = arith.constant dense<0.000000e+00> : vector<16x8xf32>
    %68 = tpu.matmul %0, %67, %cst_67 {dimension_numbers = #tpu.dot_dimension_numbers<[1], [0], [0], [1], [0, 0, 1, 1], [], []>} : vector<16x32xf32>, vector<32x8xf32>, vector<16x8xf32> -> vector<16x8xf32>
    %c3_68 = arith.constant 3 : index
    %c0_69 = arith.constant 0 : index
    %c0_70 = arith.constant 0 : index
    %69 = vector.load %arg4[%c3_68, %c0_69, %c0_70] : memref<4x1x8xf32, #tpu.memory_space<vmem>>, vector<1x1x8xf32>
    %70 = vector.shape_cast %69 : vector<1x1x8xf32> to vector<1x8xf32>
    %71 = vector.broadcast %70 : vector<1x8xf32> to vector<16x8xf32>
    %72 = arith.addf %68, %71 : vector<16x8xf32>
    %c3_71 = arith.constant 3 : index
    %c0_72 = arith.constant 0 : index
    %c0_73 = arith.constant 0 : index
    %73 = vector.load %arg5[%c3_71, %c0_72, %c0_73] : memref<4x32x8xf32, #tpu.memory_space<vmem>>, vector<1x32x8xf32>
    %74 = vector.shape_cast %73 : vector<1x32x8xf32> to vector<32x8xf32>
    %cst_74 = arith.constant dense<0.000000e+00> : vector<16x8xf32>
    %75 = tpu.matmul %1, %74, %cst_74 {dimension_numbers = #tpu.dot_dimension_numbers<[1], [0], [0], [1], [0, 0, 1, 1], [], []>} : vector<16x32xf32>, vector<32x8xf32>, vector<16x8xf32> -> vector<16x8xf32>
    %c3_75 = arith.constant 3 : index
    %c0_76 = arith.constant 0 : index
    %c0_77 = arith.constant 0 : index
    %76 = vector.load %arg6[%c3_75, %c0_76, %c0_77] : memref<4x1x8xf32, #tpu.memory_space<vmem>>, vector<1x1x8xf32>
    %77 = vector.shape_cast %76 : vector<1x1x8xf32> to vector<1x8xf32>
    %78 = vector.broadcast %77 : vector<1x8xf32> to vector<16x8xf32>
    %79 = arith.addf %75, %78 : vector<16x8xf32>
    %c3_78 = arith.constant 3 : index
    %c0_79 = arith.constant 0 : index
    %c0_80 = arith.constant 0 : index
    %80 = vector.load %arg7[%c3_78, %c0_79, %c0_80] : memref<4x32x8xf32, #tpu.memory_space<vmem>>, vector<1x32x8xf32>
    %81 = vector.shape_cast %80 : vector<1x32x8xf32> to vector<32x8xf32>
    %cst_81 = arith.constant dense<0.000000e+00> : vector<16x8xf32>
    %82 = tpu.matmul %2, %81, %cst_81 {dimension_numbers = #tpu.dot_dimension_numbers<[1], [0], [0], [1], [0, 0, 1, 1], [], []>} : vector<16x32xf32>, vector<32x8xf32>, vector<16x8xf32> -> vector<16x8xf32>
    %c3_82 = arith.constant 3 : index
    %c0_83 = arith.constant 0 : index
    %c0_84 = arith.constant 0 : index
    %83 = vector.load %arg8[%c3_82, %c0_83, %c0_84] : memref<4x1x8xf32, #tpu.memory_space<vmem>>, vector<1x1x8xf32>
    %84 = vector.shape_cast %83 : vector<1x1x8xf32> to vector<1x8xf32>
    %85 = vector.broadcast %84 : vector<1x8xf32> to vector<16x8xf32>
    %86 = arith.addf %82, %85 : vector<16x8xf32>
    %c0_85 = arith.constant 0 : index
    %c0_86 = arith.constant 0 : index
    %87 = vector.load %arg10[%c0_85, %c0_86] : memref<1x32xf32, #tpu.memory_space<vmem>>, vector<1x32xf32>
    %88 = vector.extract_strided_slice %9 {offsets = [0, 0], sizes = [8, 8], strides = [1, 1]} : vector<16x8xf32> to vector<8x8xf32>
    %89 = vector.extract_strided_slice %16 {offsets = [0, 0], sizes = [8, 8], strides = [1, 1]} : vector<16x8xf32> to vector<8x8xf32>
    %90 = vector.extract_strided_slice %23 {offsets = [0, 0], sizes = [8, 8], strides = [1, 1]} : vector<16x8xf32> to vector<8x8xf32>
    %cst_87 = arith.constant dense<0.000000e+00> : vector<8x8xf32>
    %91 = tpu.matmul %88, %89, %cst_87 {dimension_numbers = #tpu.dot_dimension_numbers<[1], [1], [0], [0], [0, 0, 1, 0], [], []>} : vector<8x8xf32>, vector<8x8xf32>, vector<8x8xf32> -> vector<8x8xf32>
    %cst_88 = arith.constant dense<0xFF800000> : vector<8xf32>
    %92 = vector.multi_reduction <maximumf>, %91, %cst_88 [1] : vector<8x8xf32> to vector<8xf32>
    %93 = vector.shape_cast %92 : vector<8xf32> to vector<8x1xf32>
    %94 = vector.broadcast %93 : vector<8x1xf32> to vector<8x8xf32>
    %95 = arith.subf %91, %94 : vector<8x8xf32>
    %96 = math.exp %95 : vector<8x8xf32>
    %cst_89 = arith.constant dense<0.000000e+00> : vector<8xf32>
    %97 = vector.multi_reduction <add>, %96, %cst_89 [1] : vector<8x8xf32> to vector<8xf32>
    %98 = vector.shape_cast %97 : vector<8xf32> to vector<8x1xf32>
    %99 = tpu.reciprocal %98 {approx = true} : vector<8x1xf32> -> vector<8x1xf32>
    %100 = arith.mulf %98, %99 : vector<8x1xf32>
    %cst_90 = arith.constant 2.000000e+00 : f32
    %101 = vector.broadcast %cst_90 : f32 to vector<8x1xf32>
    %102 = arith.subf %101, %100 : vector<8x1xf32>
    %103 = arith.mulf %99, %102 : vector<8x1xf32>
    %104 = vector.broadcast %103 : vector<8x1xf32> to vector<8x8xf32>
    %105 = arith.mulf %96, %104 : vector<8x8xf32>
    %cst_91 = arith.constant dense<0.000000e+00> : vector<8x8xf32>
    %106 = tpu.matmul %105, %90, %cst_91 {dimension_numbers = #tpu.dot_dimension_numbers<[1], [0], [0], [1], [0, 0, 1, 1], [], []>} : vector<8x8xf32>, vector<8x8xf32>, vector<8x8xf32> -> vector<8x8xf32>
    %c0_92 = arith.constant 0 : index
    %c0_93 = arith.constant 0 : index
    %c0_94 = arith.constant 0 : index
    %107 = vector.load %arg9[%c0_92, %c0_93, %c0_94] : memref<4x8x32xf32, #tpu.memory_space<vmem>>, vector<1x8x32xf32>
    %108 = vector.shape_cast %107 : vector<1x8x32xf32> to vector<8x32xf32>
    %cst_95 = arith.constant dense<0.000000e+00> : vector<8x32xf32>
    %109 = tpu.matmul %106, %108, %cst_95 {dimension_numbers = #tpu.dot_dimension_numbers<[1], [0], [0], [1], [0, 0, 1, 1], [], []>} : vector<8x8xf32>, vector<8x32xf32>, vector<8x32xf32> -> vector<8x32xf32>
    %110 = vector.extract_strided_slice %30 {offsets = [0, 0], sizes = [8, 8], strides = [1, 1]} : vector<16x8xf32> to vector<8x8xf32>
    %111 = vector.extract_strided_slice %37 {offsets = [0, 0], sizes = [8, 8], strides = [1, 1]} : vector<16x8xf32> to vector<8x8xf32>
    %112 = vector.extract_strided_slice %44 {offsets = [0, 0], sizes = [8, 8], strides = [1, 1]} : vector<16x8xf32> to vector<8x8xf32>
    %cst_96 = arith.constant dense<0.000000e+00> : vector<8x8xf32>
    %113 = tpu.matmul %110, %111, %cst_96 {dimension_numbers = #tpu.dot_dimension_numbers<[1], [1], [0], [0], [0, 0, 1, 0], [], []>} : vector<8x8xf32>, vector<8x8xf32>, vector<8x8xf32> -> vector<8x8xf32>
    %cst_97 = arith.constant dense<0xFF800000> : vector<8xf32>
    %114 = vector.multi_reduction <maximumf>, %113, %cst_97 [1] : vector<8x8xf32> to vector<8xf32>
    %115 = vector.shape_cast %114 : vector<8xf32> to vector<8x1xf32>
    %116 = vector.broadcast %115 : vector<8x1xf32> to vector<8x8xf32>
    %117 = arith.subf %113, %116 : vector<8x8xf32>
    %118 = math.exp %117 : vector<8x8xf32>
    %cst_98 = arith.constant dense<0.000000e+00> : vector<8xf32>
    %119 = vector.multi_reduction <add>, %118, %cst_98 [1] : vector<8x8xf32> to vector<8xf32>
    %120 = vector.shape_cast %119 : vector<8xf32> to vector<8x1xf32>
    %121 = tpu.reciprocal %120 {approx = true} : vector<8x1xf32> -> vector<8x1xf32>
    %122 = arith.mulf %120, %121 : vector<8x1xf32>
    %cst_99 = arith.constant 2.000000e+00 : f32
    %123 = vector.broadcast %cst_99 : f32 to vector<8x1xf32>
    %124 = arith.subf %123, %122 : vector<8x1xf32>
    %125 = arith.mulf %121, %124 : vector<8x1xf32>
    %126 = vector.broadcast %125 : vector<8x1xf32> to vector<8x8xf32>
    %127 = arith.mulf %118, %126 : vector<8x8xf32>
    %cst_100 = arith.constant dense<0.000000e+00> : vector<8x8xf32>
    %128 = tpu.matmul %127, %112, %cst_100 {dimension_numbers = #tpu.dot_dimension_numbers<[1], [0], [0], [1], [0, 0, 1, 1], [], []>} : vector<8x8xf32>, vector<8x8xf32>, vector<8x8xf32> -> vector<8x8xf32>
    %c1_101 = arith.constant 1 : index
    %c0_102 = arith.constant 0 : index
    %c0_103 = arith.constant 0 : index
    %129 = vector.load %arg9[%c1_101, %c0_102, %c0_103] : memref<4x8x32xf32, #tpu.memory_space<vmem>>, vector<1x8x32xf32>
    %130 = vector.shape_cast %129 : vector<1x8x32xf32> to vector<8x32xf32>
    %cst_104 = arith.constant dense<0.000000e+00> : vector<8x32xf32>
    %131 = tpu.matmul %128, %130, %cst_104 {dimension_numbers = #tpu.dot_dimension_numbers<[1], [0], [0], [1], [0, 0, 1, 1], [], []>} : vector<8x8xf32>, vector<8x32xf32>, vector<8x32xf32> -> vector<8x32xf32>
    %132 = arith.addf %109, %131 : vector<8x32xf32>
    %133 = vector.extract_strided_slice %51 {offsets = [0, 0], sizes = [8, 8], strides = [1, 1]} : vector<16x8xf32> to vector<8x8xf32>
    %134 = vector.extract_strided_slice %58 {offsets = [0, 0], sizes = [8, 8], strides = [1, 1]} : vector<16x8xf32> to vector<8x8xf32>
    %135 = vector.extract_strided_slice %65 {offsets = [0, 0], sizes = [8, 8], strides = [1, 1]} : vector<16x8xf32> to vector<8x8xf32>
    %cst_105 = arith.constant dense<0.000000e+00> : vector<8x8xf32>
    %136 = tpu.matmul %133, %134, %cst_105 {dimension_numbers = #tpu.dot_dimension_numbers<[1], [1], [0], [0], [0, 0, 1, 0], [], []>} : vector<8x8xf32>, vector<8x8xf32>, vector<8x8xf32> -> vector<8x8xf32>
    %cst_106 = arith.constant dense<0xFF800000> : vector<8xf32>
    %137 = vector.multi_reduction <maximumf>, %136, %cst_106 [1] : vector<8x8xf32> to vector<8xf32>
    %138 = vector.shape_cast %137 : vector<8xf32> to vector<8x1xf32>
    %139 = vector.broadcast %138 : vector<8x1xf32> to vector<8x8xf32>
    %140 = arith.subf %136, %139 : vector<8x8xf32>
    %141 = math.exp %140 : vector<8x8xf32>
    %cst_107 = arith.constant dense<0.000000e+00> : vector<8xf32>
    %142 = vector.multi_reduction <add>, %141, %cst_107 [1] : vector<8x8xf32> to vector<8xf32>
    %143 = vector.shape_cast %142 : vector<8xf32> to vector<8x1xf32>
    %144 = tpu.reciprocal %143 {approx = true} : vector<8x1xf32> -> vector<8x1xf32>
    %145 = arith.mulf %143, %144 : vector<8x1xf32>
    %cst_108 = arith.constant 2.000000e+00 : f32
    %146 = vector.broadcast %cst_108 : f32 to vector<8x1xf32>
    %147 = arith.subf %146, %145 : vector<8x1xf32>
    %148 = arith.mulf %144, %147 : vector<8x1xf32>
    %149 = vector.broadcast %148 : vector<8x1xf32> to vector<8x8xf32>
    %150 = arith.mulf %141, %149 : vector<8x8xf32>
    %cst_109 = arith.constant dense<0.000000e+00> : vector<8x8xf32>
    %151 = tpu.matmul %150, %135, %cst_109 {dimension_numbers = #tpu.dot_dimension_numbers<[1], [0], [0], [1], [0, 0, 1, 1], [], []>} : vector<8x8xf32>, vector<8x8xf32>, vector<8x8xf32> -> vector<8x8xf32>
    %c2_110 = arith.constant 2 : index
    %c0_111 = arith.constant 0 : index
    %c0_112 = arith.constant 0 : index
    %152 = vector.load %arg9[%c2_110, %c0_111, %c0_112] : memref<4x8x32xf32, #tpu.memory_space<vmem>>, vector<1x8x32xf32>
    %153 = vector.shape_cast %152 : vector<1x8x32xf32> to vector<8x32xf32>
    %cst_113 = arith.constant dense<0.000000e+00> : vector<8x32xf32>
    %154 = tpu.matmul %151, %153, %cst_113 {dimension_numbers = #tpu.dot_dimension_numbers<[1], [0], [0], [1], [0, 0, 1, 1], [], []>} : vector<8x8xf32>, vector<8x32xf32>, vector<8x32xf32> -> vector<8x32xf32>
    %155 = arith.addf %132, %154 : vector<8x32xf32>
    %156 = vector.extract_strided_slice %72 {offsets = [0, 0], sizes = [8, 8], strides = [1, 1]} : vector<16x8xf32> to vector<8x8xf32>
    %157 = vector.extract_strided_slice %79 {offsets = [0, 0], sizes = [8, 8], strides = [1, 1]} : vector<16x8xf32> to vector<8x8xf32>
    %158 = vector.extract_strided_slice %86 {offsets = [0, 0], sizes = [8, 8], strides = [1, 1]} : vector<16x8xf32> to vector<8x8xf32>
    %cst_114 = arith.constant dense<0.000000e+00> : vector<8x8xf32>
    %159 = tpu.matmul %156, %157, %cst_114 {dimension_numbers = #tpu.dot_dimension_numbers<[1], [1], [0], [0], [0, 0, 1, 0], [], []>} : vector<8x8xf32>, vector<8x8xf32>, vector<8x8xf32> -> vector<8x8xf32>
    %cst_115 = arith.constant dense<0xFF800000> : vector<8xf32>
    %160 = vector.multi_reduction <maximumf>, %159, %cst_115 [1] : vector<8x8xf32> to vector<8xf32>
    %161 = vector.shape_cast %160 : vector<8xf32> to vector<8x1xf32>
    %162 = vector.broadcast %161 : vector<8x1xf32> to vector<8x8xf32>
    %163 = arith.subf %159, %162 : vector<8x8xf32>
    %164 = math.exp %163 : vector<8x8xf32>
    %cst_116 = arith.constant dense<0.000000e+00> : vector<8xf32>
    %165 = vector.multi_reduction <add>, %164, %cst_116 [1] : vector<8x8xf32> to vector<8xf32>
    %166 = vector.shape_cast %165 : vector<8xf32> to vector<8x1xf32>
    %167 = tpu.reciprocal %166 {approx = true} : vector<8x1xf32> -> vector<8x1xf32>
    %168 = arith.mulf %166, %167 : vector<8x1xf32>
    %cst_117 = arith.constant 2.000000e+00 : f32
    %169 = vector.broadcast %cst_117 : f32 to vector<8x1xf32>
    %170 = arith.subf %169, %168 : vector<8x1xf32>
    %171 = arith.mulf %167, %170 : vector<8x1xf32>
    %172 = vector.broadcast %171 : vector<8x1xf32> to vector<8x8xf32>
    %173 = arith.mulf %164, %172 : vector<8x8xf32>
    %cst_118 = arith.constant dense<0.000000e+00> : vector<8x8xf32>
    %174 = tpu.matmul %173, %158, %cst_118 {dimension_numbers = #tpu.dot_dimension_numbers<[1], [0], [0], [1], [0, 0, 1, 1], [], []>} : vector<8x8xf32>, vector<8x8xf32>, vector<8x8xf32> -> vector<8x8xf32>
    %c3_119 = arith.constant 3 : index
    %c0_120 = arith.constant 0 : index
    %c0_121 = arith.constant 0 : index
    %175 = vector.load %arg9[%c3_119, %c0_120, %c0_121] : memref<4x8x32xf32, #tpu.memory_space<vmem>>, vector<1x8x32xf32>
    %176 = vector.shape_cast %175 : vector<1x8x32xf32> to vector<8x32xf32>
    %cst_122 = arith.constant dense<0.000000e+00> : vector<8x32xf32>
    %177 = tpu.matmul %174, %176, %cst_122 {dimension_numbers = #tpu.dot_dimension_numbers<[1], [0], [0], [1], [0, 0, 1, 1], [], []>} : vector<8x8xf32>, vector<8x32xf32>, vector<8x32xf32> -> vector<8x32xf32>
    %178 = arith.addf %155, %177 : vector<8x32xf32>
    %179 = vector.shape_cast %105 : vector<8x8xf32> to vector<1x8x8xf32>
    %180 = vector.shape_cast %127 : vector<8x8xf32> to vector<1x8x8xf32>
    %181 = vector.shape_cast %150 : vector<8x8xf32> to vector<1x8x8xf32>
    %182 = vector.shape_cast %173 : vector<8x8xf32> to vector<1x8x8xf32>
    %183 = tpu.concatenate %179, %180, %181, %182 in 0 : vector<1x8x8xf32>, vector<1x8x8xf32>, vector<1x8x8xf32>, vector<1x8x8xf32> -> vector<4x8x8xf32>
    %c0_123 = arith.constant 0 : index
    %c0_124 = arith.constant 0 : index
    %c0_125 = arith.constant 0 : index
    %c0_126 = arith.constant 0 : index
    %184 = vector.load %arg12[%c0_123, %c0_124, %c0_125, %c0_126] : memref<2x4x8x8xf32, #tpu.memory_space<vmem>>, vector<1x4x8x8xf32>
    %185 = vector.shape_cast %184 : vector<1x4x8x8xf32> to vector<4x8x8xf32>
    %186 = vector.shape_cast %183 : vector<4x8x8xf32> to vector<1x4x8x8xf32>
    tpu.vector_store %arg12[%c0_123, %c0_124, %c0_125, %c0_126], %186 {strides = array<i32>} : memref<2x4x8x8xf32, #tpu.memory_space<vmem>>, vector<1x4x8x8xf32>,
    %187 = vector.broadcast %87 : vector<1x32xf32> to vector<8x32xf32>
    %188 = arith.addf %178, %187 : vector<8x32xf32>
    %c0_127 = arith.constant 0 : index
    %c0_128 = arith.constant 0 : index
    %c0_129 = arith.constant 0 : index
    %189 = vector.load %arg11[%c0_127, %c0_128, %c0_129] : memref<2x8x32xf32, #tpu.memory_space<vmem>>, vector<1x8x32xf32>
    %190 = vector.shape_cast %189 : vector<1x8x32xf32> to vector<8x32xf32>
    %191 = vector.shape_cast %188 : vector<8x32xf32> to vector<1x8x32xf32>
    tpu.vector_store %arg11[%c0_127, %c0_128, %c0_129], %191 {strides = array<i32>} : memref<2x8x32xf32, #tpu.memory_space<vmem>>, vector<1x8x32xf32>,
    %192 = vector.extract_strided_slice %9 {offsets = [8, 0], sizes = [8, 8], strides = [1, 1]} : vector<16x8xf32> to vector<8x8xf32>
    %193 = vector.extract_strided_slice %16 {offsets = [8, 0], sizes = [8, 8], strides = [1, 1]} : vector<16x8xf32> to vector<8x8xf32>
    %194 = vector.extract_strided_slice %23 {offsets = [8, 0], sizes = [8, 8], strides = [1, 1]} : vector<16x8xf32> to vector<8x8xf32>
    %cst_130 = arith.constant dense<0.000000e+00> : vector<8x8xf32>
    %195 = tpu.matmul %192, %193, %cst_130 {dimension_numbers = #tpu.dot_dimension_numbers<[1], [1], [0], [0], [0, 0, 1, 0], [], []>} : vector<8x8xf32>, vector<8x8xf32>, vector<8x8xf32> -> vector<8x8xf32>
    %cst_131 = arith.constant dense<0xFF800000> : vector<8xf32>
    %196 = vector.multi_reduction <maximumf>, %195, %cst_131 [1] : vector<8x8xf32> to vector<8xf32>
    %197 = vector.shape_cast %196 : vector<8xf32> to vector<8x1xf32>
    %198 = vector.broadcast %197 : vector<8x1xf32> to vector<8x8xf32>
    %199 = arith.subf %195, %198 : vector<8x8xf32>
    %200 = math.exp %199 : vector<8x8xf32>
    %cst_132 = arith.constant dense<0.000000e+00> : vector<8xf32>
    %201 = vector.multi_reduction <add>, %200, %cst_132 [1] : vector<8x8xf32> to vector<8xf32>
    %202 = vector.shape_cast %201 : vector<8xf32> to vector<8x1xf32>
    %203 = tpu.reciprocal %202 {approx = true} : vector<8x1xf32> -> vector<8x1xf32>
    %204 = arith.mulf %202, %203 : vector<8x1xf32>
    %cst_133 = arith.constant 2.000000e+00 : f32
    %205 = vector.broadcast %cst_133 : f32 to vector<8x1xf32>
    %206 = arith.subf %205, %204 : vector<8x1xf32>
    %207 = arith.mulf %203, %206 : vector<8x1xf32>
    %208 = vector.broadcast %207 : vector<8x1xf32> to vector<8x8xf32>
    %209 = arith.mulf %200, %208 : vector<8x8xf32>
    %cst_134 = arith.constant dense<0.000000e+00> : vector<8x8xf32>
    %210 = tpu.matmul %209, %194, %cst_134 {dimension_numbers = #tpu.dot_dimension_numbers<[1], [0], [0], [1], [0, 0, 1, 1], [], []>} : vector<8x8xf32>, vector<8x8xf32>, vector<8x8xf32> -> vector<8x8xf32>
    %c0_135 = arith.constant 0 : index
    %c0_136 = arith.constant 0 : index
    %c0_137 = arith.constant 0 : index
    %211 = vector.load %arg9[%c0_135, %c0_136, %c0_137] : memref<4x8x32xf32, #tpu.memory_space<vmem>>, vector<1x8x32xf32>
    %212 = vector.shape_cast %211 : vector<1x8x32xf32> to vector<8x32xf32>
    %cst_138 = arith.constant dense<0.000000e+00> : vector<8x32xf32>
    %213 = tpu.matmul %210, %212, %cst_138 {dimension_numbers = #tpu.dot_dimension_numbers<[1], [0], [0], [1], [0, 0, 1, 1], [], []>} : vector<8x8xf32>, vector<8x32xf32>, vector<8x32xf32> -> vector<8x32xf32>
    %214 = vector.extract_strided_slice %30 {offsets = [8, 0], sizes = [8, 8], strides = [1, 1]} : vector<16x8xf32> to vector<8x8xf32>
    %215 = vector.extract_strided_slice %37 {offsets = [8, 0], sizes = [8, 8], strides = [1, 1]} : vector<16x8xf32> to vector<8x8xf32>
    %216 = vector.extract_strided_slice %44 {offsets = [8, 0], sizes = [8, 8], strides = [1, 1]} : vector<16x8xf32> to vector<8x8xf32>
    %cst_139 = arith.constant dense<0.000000e+00> : vector<8x8xf32>
    %217 = tpu.matmul %214, %215, %cst_139 {dimension_numbers = #tpu.dot_dimension_numbers<[1], [1], [0], [0], [0, 0, 1, 0], [], []>} : vector<8x8xf32>, vector<8x8xf32>, vector<8x8xf32> -> vector<8x8xf32>
    %cst_140 = arith.constant dense<0xFF800000> : vector<8xf32>
    %218 = vector.multi_reduction <maximumf>, %217, %cst_140 [1] : vector<8x8xf32> to vector<8xf32>
    %219 = vector.shape_cast %218 : vector<8xf32> to vector<8x1xf32>
    %220 = vector.broadcast %219 : vector<8x1xf32> to vector<8x8xf32>
    %221 = arith.subf %217, %220 : vector<8x8xf32>
    %222 = math.exp %221 : vector<8x8xf32>
    %cst_141 = arith.constant dense<0.000000e+00> : vector<8xf32>
    %223 = vector.multi_reduction <add>, %222, %cst_141 [1] : vector<8x8xf32> to vector<8xf32>
    %224 = vector.shape_cast %223 : vector<8xf32> to vector<8x1xf32>
    %225 = tpu.reciprocal %224 {approx = true} : vector<8x1xf32> -> vector<8x1xf32>
    %226 = arith.mulf %224, %225 : vector<8x1xf32>
    %cst_142 = arith.constant 2.000000e+00 : f32
    %227 = vector.broadcast %cst_142 : f32 to vector<8x1xf32>
    %228 = arith.subf %227, %226 : vector<8x1xf32>
    %229 = arith.mulf %225, %228 : vector<8x1xf32>
    %230 = vector.broadcast %229 : vector<8x1xf32> to vector<8x8xf32>
    %231 = arith.mulf %222, %230 : vector<8x8xf32>
    %cst_143 = arith.constant dense<0.000000e+00> : vector<8x8xf32>
    %232 = tpu.matmul %231, %216, %cst_143 {dimension_numbers = #tpu.dot_dimension_numbers<[1], [0], [0], [1], [0, 0, 1, 1], [], []>} : vector<8x8xf32>, vector<8x8xf32>, vector<8x8xf32> -> vector<8x8xf32>
    %c1_144 = arith.constant 1 : index
    %c0_145 = arith.constant 0 : index
    %c0_146 = arith.constant 0 : index
    %233 = vector.load %arg9[%c1_144, %c0_145, %c0_146] : memref<4x8x32xf32, #tpu.memory_space<vmem>>, vector<1x8x32xf32>
    %234 = vector.shape_cast %233 : vector<1x8x32xf32> to vector<8x32xf32>
    %cst_147 = arith.constant dense<0.000000e+00> : vector<8x32xf32>
    %235 = tpu.matmul %232, %234, %cst_147 {dimension_numbers = #tpu.dot_dimension_numbers<[1], [0], [0], [1], [0, 0, 1, 1], [], []>} : vector<8x8xf32>, vector<8x32xf32>, vector<8x32xf32> -> vector<8x32xf32>
    %236 = arith.addf %213, %235 : vector<8x32xf32>
    %237 = vector.extract_strided_slice %51 {offsets = [8, 0], sizes = [8, 8], strides = [1, 1]} : vector<16x8xf32> to vector<8x8xf32>
    %238 = vector.extract_strided_slice %58 {offsets = [8, 0], sizes = [8, 8], strides = [1, 1]} : vector<16x8xf32> to vector<8x8xf32>
    %239 = vector.extract_strided_slice %65 {offsets = [8, 0], sizes = [8, 8], strides = [1, 1]} : vector<16x8xf32> to vector<8x8xf32>
    %cst_148 = arith.constant dense<0.000000e+00> : vector<8x8xf32>
    %240 = tpu.matmul %237, %238, %cst_148 {dimension_numbers = #tpu.dot_dimension_numbers<[1], [1], [0], [0], [0, 0, 1, 0], [], []>} : vector<8x8xf32>, vector<8x8xf32>, vector<8x8xf32> -> vector<8x8xf32>
    %cst_149 = arith.constant dense<0xFF800000> : vector<8xf32>
    %241 = vector.multi_reduction <maximumf>, %240, %cst_149 [1] : vector<8x8xf32> to vector<8xf32>
    %242 = vector.shape_cast %241 : vector<8xf32> to vector<8x1xf32>
    %243 = vector.broadcast %242 : vector<8x1xf32> to vector<8x8xf32>
    %244 = arith.subf %240, %243 : vector<8x8xf32>
    %245 = math.exp %244 : vector<8x8xf32>
    %cst_150 = arith.constant dense<0.000000e+00> : vector<8xf32>
    %246 = vector.multi_reduction <add>, %245, %cst_150 [1] : vector<8x8xf32> to vector<8xf32>
    %247 = vector.shape_cast %246 : vector<8xf32> to vector<8x1xf32>
    %248 = tpu.reciprocal %247 {approx = true} : vector<8x1xf32> -> vector<8x1xf32>
    %249 = arith.mulf %247, %248 : vector<8x1xf32>
    %cst_151 = arith.constant 2.000000e+00 : f32
    %250 = vector.broadcast %cst_151 : f32 to vector<8x1xf32>
    %251 = arith.subf %250, %249 : vector<8x1xf32>
    %252 = arith.mulf %248, %251 : vector<8x1xf32>
    %253 = vector.broadcast %252 : vector<8x1xf32> to vector<8x8xf32>
    %254 = arith.mulf %245, %253 : vector<8x8xf32>
    %cst_152 = arith.constant dense<0.000000e+00> : vector<8x8xf32>
    %255 = tpu.matmul %254, %239, %cst_152 {dimension_numbers = #tpu.dot_dimension_numbers<[1], [0], [0], [1], [0, 0, 1, 1], [], []>} : vector<8x8xf32>, vector<8x8xf32>, vector<8x8xf32> -> vector<8x8xf32>
    %c2_153 = arith.constant 2 : index
    %c0_154 = arith.constant 0 : index
    %c0_155 = arith.constant 0 : index
    %256 = vector.load %arg9[%c2_153, %c0_154, %c0_155] : memref<4x8x32xf32, #tpu.memory_space<vmem>>, vector<1x8x32xf32>
    %257 = vector.shape_cast %256 : vector<1x8x32xf32> to vector<8x32xf32>
    %cst_156 = arith.constant dense<0.000000e+00> : vector<8x32xf32>
    %258 = tpu.matmul %255, %257, %cst_156 {dimension_numbers = #tpu.dot_dimension_numbers<[1], [0], [0], [1], [0, 0, 1, 1], [], []>} : vector<8x8xf32>, vector<8x32xf32>, vector<8x32xf32> -> vector<8x32xf32>
    %259 = arith.addf %236, %258 : vector<8x32xf32>
    %260 = vector.extract_strided_slice %72 {offsets = [8, 0], sizes = [8, 8], strides = [1, 1]} : vector<16x8xf32> to vector<8x8xf32>
    %261 = vector.extract_strided_slice %79 {offsets = [8, 0], sizes = [8, 8], strides = [1, 1]} : vector<16x8xf32> to vector<8x8xf32>
    %262 = vector.extract_strided_slice %86 {offsets = [8, 0], sizes = [8, 8], strides = [1, 1]} : vector<16x8xf32> to vector<8x8xf32>
    %cst_157 = arith.constant dense<0.000000e+00> : vector<8x8xf32>
    %263 = tpu.matmul %260, %261, %cst_157 {dimension_numbers = #tpu.dot_dimension_numbers<[1], [1], [0], [0], [0, 0, 1, 0], [], []>} : vector<8x8xf32>, vector<8x8xf32>, vector<8x8xf32> -> vector<8x8xf32>
    %cst_158 = arith.constant dense<0xFF800000> : vector<8xf32>
    %264 = vector.multi_reduction <maximumf>, %263, %cst_158 [1] : vector<8x8xf32> to vector<8xf32>
    %265 = vector.shape_cast %264 : vector<8xf32> to vector<8x1xf32>
    %266 = vector.broadcast %265 : vector<8x1xf32> to vector<8x8xf32>
    %267 = arith.subf %263, %266 : vector<8x8xf32>
    %268 = math.exp %267 : vector<8x8xf32>
    %cst_159 = arith.constant dense<0.000000e+00> : vector<8xf32>
    %269 = vector.multi_reduction <add>, %268, %cst_159 [1] : vector<8x8xf32> to vector<8xf32>
    %270 = vector.shape_cast %269 : vector<8xf32> to vector<8x1xf32>
    %271 = tpu.reciprocal %270 {approx = true} : vector<8x1xf32> -> vector<8x1xf32>
    %272 = arith.mulf %270, %271 : vector<8x1xf32>
    %cst_160 = arith.constant 2.000000e+00 : f32
    %273 = vector.broadcast %cst_160 : f32 to vector<8x1xf32>
    %274 = arith.subf %273, %272 : vector<8x1xf32>
    %275 = arith.mulf %271, %274 : vector<8x1xf32>
    %276 = vector.broadcast %275 : vector<8x1xf32> to vector<8x8xf32>
    %277 = arith.mulf %268, %276 : vector<8x8xf32>
    %cst_161 = arith.constant dense<0.000000e+00> : vector<8x8xf32>
    %278 = tpu.matmul %277, %262, %cst_161 {dimension_numbers = #tpu.dot_dimension_numbers<[1], [0], [0], [1], [0, 0, 1, 1], [], []>} : vector<8x8xf32>, vector<8x8xf32>, vector<8x8xf32> -> vector<8x8xf32>
    %c3_162 = arith.constant 3 : index
    %c0_163 = arith.constant 0 : index
    %c0_164 = arith.constant 0 : index
    %279 = vector.load %arg9[%c3_162, %c0_163, %c0_164] : memref<4x8x32xf32, #tpu.memory_space<vmem>>, vector<1x8x32xf32>
    %280 = vector.shape_cast %279 : vector<1x8x32xf32> to vector<8x32xf32>
    %cst_165 = arith.constant dense<0.000000e+00> : vector<8x32xf32>
    %281 = tpu.matmul %278, %280, %cst_165 {dimension_numbers = #tpu.dot_dimension_numbers<[1], [0], [0], [1], [0, 0, 1, 1], [], []>} : vector<8x8xf32>, vector<8x32xf32>, vector<8x32xf32> -> vector<8x32xf32>
    %282 = arith.addf %259, %281 : vector<8x32xf32>
    %283 = vector.shape_cast %209 : vector<8x8xf32> to vector<1x8x8xf32>
    %284 = vector.shape_cast %231 : vector<8x8xf32> to vector<1x8x8xf32>
    %285 = vector.shape_cast %254 : vector<8x8xf32> to vector<1x8x8xf32>
    %286 = vector.shape_cast %277 : vector<8x8xf32> to vector<1x8x8xf32>
    %287 = tpu.concatenate %283, %284, %285, %286 in 0 : vector<1x8x8xf32>, vector<1x8x8xf32>, vector<1x8x8xf32>, vector<1x8x8xf32> -> vector<4x8x8xf32>
    %c1_166 = arith.constant 1 : index
    %c0_167 = arith.constant 0 : index
    %c0_168 = arith.constant 0 : index
    %c0_169 = arith.constant 0 : index
    %288 = vector.load %arg12[%c1_166, %c0_167, %c0_168, %c0_169] : memref<2x4x8x8xf32, #tpu.memory_space<vmem>>, vector<1x4x8x8xf32>
    %289 = vector.shape_cast %288 : vector<1x4x8x8xf32> to vector<4x8x8xf32>
    %290 = vector.shape_cast %287 : vector<4x8x8xf32> to vector<1x4x8x8xf32>
    tpu.vector_store %arg12[%c1_166, %c0_167, %c0_168, %c0_169], %290 {strides = array<i32>} : memref<2x4x8x8xf32, #tpu.memory_space<vmem>>, vector<1x4x8x8xf32>,
    %291 = vector.broadcast %87 : vector<1x32xf32> to vector<8x32xf32>
    %292 = arith.addf %282, %291 : vector<8x32xf32>
    %c1_170 = arith.constant 1 : index
    %c0_171 = arith.constant 0 : index
    %c0_172 = arith.constant 0 : index
    %293 = vector.load %arg11[%c1_170, %c0_171, %c0_172] : memref<2x8x32xf32, #tpu.memory_space<vmem>>, vector<1x8x32xf32>
    %294 = vector.shape_cast %293 : vector<1x8x32xf32> to vector<8x32xf32>
    %295 = vector.shape_cast %292 : vector<8x32xf32> to vector<1x8x32xf32>
    tpu.vector_store %arg11[%c1_170, %c0_171, %c0_172], %295 {strides = array<i32>} : memref<2x8x32xf32, #tpu.memory_space<vmem>>, vector<1x8x32xf32>,
    return
  }
}

</mosaic_0001>

<bundles_post_ra>
// kernel: tpu_custom_call.1
= control target key start
LH: loop header
LB: loop body
LE: loop exit
PB: predicated region body
PF: predicated region fallthrough
CT: control target
= control target key end

     0   :  { %18 = vsyncpa [#allocation3], 0  ;;  %vm59_vm0 = vcmask 261120   ;;  %s4337_s0 = inlined_call_operand.vmem [shape: f32[16,32], index: 0, kind: input, shape index: {}]   ;;  %s4338_s1 = inlined_call_operand.vmem [shape: f32[16,32], index: 1, kind: input, shape index: {}]   ;;  %s4339_s2 = inlined_call_operand.vmem [shape: f32[16,32], index: 2, kind: input, shape index: {}]   ;;  %s4340_s3 = inlined_call_operand.vmem [shape: f32[4,32,8], index: 3, kind: input, shape index: {}]   ;;  %s4341_s4 = inlined_call_operand.vmem [shape: f32[4,1,8], index: 4, kind: input, shape index: {}]   ;;  %s4342_s5 = inlined_call_operand.vmem [shape: f32[4,32,8], index: 5, kind: input, shape index: {}]   ;;  %s4343_s6 = inlined_call_operand.vmem [shape: f32[4,1,8], index: 6, kind: input, shape index: {}]   ;;  %s4344_s7 = inlined_call_operand.vmem [shape: f32[4,32,8], index: 7, kind: input, shape index: {}]   ;;  %s4345_s8 = inlined_call_operand.vmem [shape: f32[4,1,8], index: 8, kind: input, shape index: {}]   ;;  %s4346_s9 = inlined_call_operand.vmem [shape: f32[4,8,32], index: 9, kind: input, shape index: {}]   ;;  %s4347_s10 = inlined_call_operand.vmem [shape: f32[1,32], index: 10, kind: input, shape index: {}]   ;;  %s4348_s11 = inlined_call_operand.hbm [shape: f32[2,8,32], index: 11, kind: output, shape index: {0}]   ;;  %s4349_s12 = inlined_call_operand.hbm [shape: f32[2,4,8,8], index: 12, kind: output, shape index: {1}]  }
   0x1   :  { %v48_v0 = vld [vmem:[%s4340_s3] sm:$0xff]  ;;  %v49_v1 = vld [vmem:[%s4340_s3 + $0x8] sm:$0xff]  ;;  %v50_v5 = vld [vmem:[%s4340_s3 + $0x10] sm:$0xff] }
   0x2   :  { %v141_v2 = vld [vmem:[%s4342_s5] sm:$0xff]  ;;  %v3566_v3 = vpack.c.bf16 %v49_v1, %v48_v0  ;;  %v142_v4 = vld [vmem:[%s4342_s5 + $0x8] sm:$0xff]  ;;  %v51_v6 = vld [vmem:[%s4340_s3 + $0x18] sm:$0xff] }
   0x3   :  { %v3574_v7 = vpack.c.bf16 %v142_v4, %v141_v2  ;;  %v3570_v8 = vpack.c.bf16 %v51_v6, %v50_v5  ;;  %v143_v9 = vld [vmem:[%s4342_s5 + $0x10] sm:$0xff]  ;;  %v144_v10 = vld [vmem:[%s4342_s5 + $0x18] sm:$0xff]  ;;  %v3846_v11 = vld [vmem:[%s4337_s0] sm:$0xff] }
   0x4   :  { %3567 = vmatprep.subr.bf16.mxu0 %v3566_v3  ;;  %v3578_v12 = vpack.c.bf16 %v144_v10, %v143_v9  ;;  %3322 = vmatprep.mubr.msk.f32.mxu0 %vm59_vm0, %v3846_v11  ;;  %v3853_v13 = vld [vmem:[%s4338_s1] sm:$0xff]  ;;  %v234_v15 = vld [vmem:[%s4344_s7 + $0x8] sm:$0xff]  ;;  %v235_v17 = vld [vmem:[%s4344_s7 + $0x10] sm:$0xff] }
   0x5   :  { %3575 = vmatprep.subr.bf16.mxu1 %v3574_v7  ;;  %3569 = vmatpush3.bf16.msra.mxu0 %v3566_v3  ;;  %v233_v14 = vld [vmem:[%s4344_s7] sm:$0xff]  ;;  %v236_v18 = vld [vmem:[%s4344_s7 + $0x18] sm:$0xff]  ;;  %v3084_v20 = vld [vmem:[%s4340_s3 + $0x28] sm:$0xff] }
   0x6   :  { %3577 = vmatpush3.bf16.msra.mxu1 %v3574_v7  ;;  %3571 = vmatprep.subr.bf16.mxu0 %v3570_v8  ;;  %v3582_v16 = vpack.c.bf16 %v234_v15, %v233_v14  ;;  %v3083_v19 = vld [vmem:[%s4340_s3 + $0x20] sm:$0xff]  ;;  %v3878_v21 = vld [vmem:[%s4337_s0 + $0x8] sm:$0xff]  ;;  %v3085_v23 = vld [vmem:[%s4340_s3 + $0x30] sm:$0xff]  ;;  %v3586_v26 = vpack.c.bf16 %v236_v18, %v235_v17 }
   0x7   :  { %3579 = vmatprep.subr.bf16.mxu1 %v3578_v12  ;;  %3333 = vmatprep.mubr.msk.f32.mxu1 %vm59_vm0, %v3853_v13  ;;  %v3590_v22 = vpack.c.bf16 %v3084_v20, %v3083_v19  ;;  %v3086_v24 = vld [vmem:[%s4340_s3 + $0x38] sm:$0xff]  ;;  %v3889_v25 = vld [vmem:[%s4338_s1 + $0x8] sm:$0xff]  ;;  %v3894_v27 = vld [vmem:[%s4339_s2] sm:$0xff] }
   0x8   :  { %v3091_v28 = vld [vmem:[%s4342_s5 + $0x20] sm:$0xff]  ;;  %v3092_v29 = vld [vmem:[%s4342_s5 + $0x28] sm:$0xff]  ;;  %v3594_v30 = vpack.c.bf16 %v3086_v24, %v3085_v23  ;;  %v3093_v34 = vld [vmem:[%s4342_s5 + $0x30] sm:$0xff] }
   0x9   :  { %3573 = vmatpush3.bf16.msra.mxu0 %v3570_v8  ;;  %v3099_v31 = vld [vmem:[%s4344_s7 + $0x20] sm:$0xff]  ;;  %v3100_v32 = vld [vmem:[%s4344_s7 + $0x28] sm:$0xff]  ;;  %v3598_v33 = vpack.c.bf16 %v3092_v29, %v3091_v28  ;;  %v3094_v35 = vld [vmem:[%s4342_s5 + $0x38] sm:$0xff] }
   0xa   :  { %3581 = vmatpush3.bf16.msra.mxu1 %v3578_v12  ;;  %3583 = vmatprep.subr.bf16.mxu0 %v3582_v16  ;;  %v3925_v36 = vld [vmem:[%s4339_s2 + $0x8] sm:$0xff]  ;;  %v3606_v37 = vpack.c.bf16 %v3100_v32, %v3099_v31  ;;  %v3101_v38 = vld [vmem:[%s4344_s7 + $0x30] sm:$0xff]  ;;  %v3102_v39 = vld [vmem:[%s4344_s7 + $0x38] sm:$0xff] }
   0xb   :  { %3591 = vmatprep.subr.bf16.mxu1 %v3590_v22 }
   0xc   :  { %3323 = vmatmul.mubr.msk.f32.vlgmr.msra.gmra.mrb[0].mxu0 %vm59_vm0, %v3878_v21 }
   0xd   :  { %3334 = vmatmul.mubr.msk.f32.vlgmr.msra.gmra.mrb[0].mxu1 %vm59_vm0, %v3889_v25  ;;  %3585 = vmatpush3.bf16.msra.mxu0 %v3582_v16 }
   0xe   :  { %3587 = vmatprep.subr.bf16.mxu0 %v3586_v26  ;;  %3344 = vmatprep.mubr.msk.f32.mxu0 %vm59_vm0, %v3894_v27 }
   0xf   :  { %3593 = vmatpush3.bf16.msra.mxu1 %v3590_v22  ;;  %3355 = vmatprep.mubr.msk.f32.mxu1 %vm59_vm0, %v3846_v11 }
  0x10   :  { %3595 = vmatprep.subr.bf16.mxu1 %v3594_v30 }
  0x11   :  { %3589 = vmatpush3.bf16.msra.mxu0 %v3586_v26 }
  0x12   :  { %19 = vsyncpa [#allocation5], 0  ;;  %3599 = vmatprep.subr.bf16.mxu0 %v3598_v33  ;;  %v3602_v40 = vpack.c.bf16 %v3094_v35, %v3093_v34  ;;  %v3107_v41 = vld [vmem:[%s4340_s3 + $0x40] sm:$0xff]  ;;  %v3108_v42 = vld [vmem:[%s4340_s3 + $0x48] sm:$0xff]  ;;  %v3610_v43 = vpack.c.bf16 %v3102_v39, %v3101_v38  ;;  %vm3749_vm1 = vmmov 0   ;;  %vm1118_vm2 = vcmask 64512  }
  0x13   :  { %3597 = vmatpush3.bf16.msra.mxu1 %v3594_v30  ;;  %v3115_v44 = vld [vmem:[%s4342_s5 + $0x40] sm:$0xff]  ;;  %v3116_v45 = vld [vmem:[%s4342_s5 + $0x48] sm:$0xff]  ;;  %v3614_v46 = vpack.c.bf16 %v3108_v42, %v3107_v41  ;;  %v3109_v47 = vld [vmem:[%s4340_s3 + $0x50] sm:$0xff] }
  0x14   :  { %3345 = vmatmul.mubr.msk.f32.vlgmr.msra.gmra.mrb[2].mxu0 %vm59_vm0, %v3925_v36  ;;  %3607 = vmatprep.subr.bf16.mxu1 %v3606_v37  ;;  %v3110_v48 = vld [vmem:[%s4340_s3 + $0x58] sm:$0xff]  ;;  %v3622_v49 = vpack.c.bf16 %v3116_v45, %v3115_v44  ;;  %v3117_v50 = vld [vmem:[%s4342_s5 + $0x50] sm:$0xff]  ;;  %v3123_v53 = vld [vmem:[%s4344_s7 + $0x40] sm:$0xff] }
  0x15   :  { %3601 = vmatpush3.bf16.msra.mxu0 %v3598_v33  ;;  %3366 = vmatprep.mubr.msk.f32.mxu0 %vm59_vm0, %v3853_v13  ;;  %v3118_v51 = vld [vmem:[%s4342_s5 + $0x58] sm:$0xff]  ;;  %v3618_v52 = vpack.c.bf16 %v3110_v48, %v3109_v47  ;;  %v3124_v54 = vld [vmem:[%s4344_s7 + $0x48] sm:$0xff]  ;;  %v3131_v56 = vld [vmem:[%s4340_s3 + $0x60] sm:$0xff] }
  0x16   :  { %3603 = vmatprep.subr.bf16.mxu0 %v3602_v40  ;;  %3356 = vmatmul.mubr.msk.f32.vlgmr.msra.gmra.mrb[2].mxu1 %vm59_vm0, %v3878_v21  ;;  %v3626_v55 = vpack.c.bf16 %v3118_v51, %v3117_v50  ;;  %v3132_v57 = vld [vmem:[%s4340_s3 + $0x68] sm:$0xff]  ;;  %v3630_v58 = vpack.c.bf16 %v3124_v54, %v3123_v53  ;;  %v3125_v59 = vld [vmem:[%s4344_s7 + $0x50] sm:$0xff]  ;;  %v3126_v60 = vld [vmem:[%s4344_s7 + $0x58] sm:$0xff] }
  0x17   :  { %3609 = vmatpush3.bf16.msra.mxu1 %v3606_v37  ;;  %3377 = vmatprep.mubr.msk.f32.mxu1 %vm59_vm0, %v3894_v27  ;;  %v3638_v61 = vpack.c.bf16 %v3132_v57, %v3131_v56  ;;  %v3133_v62 = vld [vmem:[%s4340_s3 + $0x70] sm:$0xff]  ;;  %v3134_v63 = vld [vmem:[%s4340_s3 + $0x78] sm:$0xff]  ;;  %v3634_v0 = vpack.c.bf16 %v3126_v60, %v3125_v59  ;;  %v3139_v1 = vld [vmem:[%s4342_s5 + $0x60] sm:$0xff] }
  0x18   :  { %3611 = vmatprep.subr.bf16.mxu1 %v3610_v43  ;;  %v3140_v2 = vld [vmem:[%s4342_s5 + $0x68] sm:$0xff]  ;;  %v3642_v3 = vpack.c.bf16 %v3134_v63, %v3133_v62  ;;  %v3141_v5 = vld [vmem:[%s4342_s5 + $0x70] sm:$0xff]  ;;  %v3142_v6 = vld [vmem:[%s4342_s5 + $0x78] sm:$0xff] }
  0x19   :  { %3605 = vmatpush3.bf16.msra.mxu0 %v3602_v40  ;;  %v3646_v4 = vpack.c.bf16 %v3140_v2, %v3139_v1  ;;  %v3650_v7 = vpack.c.bf16 %v3142_v6, %v3141_v5  ;;  %v3147_v8 = vld [vmem:[%s4344_s7 + $0x60] sm:$0xff]  ;;  %v3148_v9 = vld [vmem:[%s4344_s7 + $0x68] sm:$0xff]  ;;  %v3149_v12 = vld [vmem:[%s4344_s7 + $0x70] sm:$0xff] }
  0x1a   :  { %3615 = vmatprep.subr.bf16.mxu0 %v3614_v46  ;;  %v3654_v10 = vpack.c.bf16 %v3148_v9, %v3147_v8  ;;  %v3074_v15 = vld [vmem:[%s4341_s4] ss:$0 sm:$0xff]  ;;  %v3096_v34 = vld [vmem:[%s4343_s6 + $0x1] ss:$0 sm:$0xff]  ;;  %v4083_v40 = vld [vmem:[%s4341_s4 + $0x2] ss:$0 sm:$0xff] }
  0x1b   :  { %3613 = vmatpush3.bf16.msra.mxu1 %v3610_v43  ;;  %v3077_v17 = vld [vmem:[%s4343_s6] ss:$0 sm:$0xff]  ;;  %v4096_v44 = vld [vmem:[%s4345_s8 + $0x2] ss:$0 sm:$0xff]  ;;  %v4106_v48 = vld [vmem:[%s4343_s6 + $0x3] ss:$0 sm:$0xff] }
  0x1c   :  { %3367 = vmatmul.mubr.msk.f32.vlgmr.msra.gmra.mrb[4].mxu0 %vm59_vm0, %v3889_v25  ;;  %3623 = vmatprep.subr.bf16.mxu1 %v3622_v49  ;;  %v3104_v5 = vld [vmem:[%s4345_s8 + $0x1] ss:$0 sm:$0xff]  ;;  %v3120_v9 = vld [vmem:[%s4343_s6 + $0x2] ss:$0 sm:$0xff] }
  0x1d   :  { %3617 = vmatpush3.bf16.msra.mxu0 %v3614_v46  ;;  %3388 = vmatprep.mubr.msk.f32.mxu0 %vm59_vm0, %v3846_v11 }
  0x1e   :  { %3619 = vmatprep.subr.bf16.mxu0 %v3618_v52  ;;  %3378 = vmatmul.mubr.msk.f32.vlgmr.msra.gmra.mrb[4].mxu1 %vm59_vm0, %v3925_v36 }
  0x1f   :  { %3625 = vmatpush3.bf16.msra.mxu1 %v3622_v49  ;;  %3399 = vmatprep.mubr.msk.f32.mxu1 %vm59_vm0, %v3853_v13 }
  0x20   :  { %3627 = vmatprep.subr.bf16.mxu1 %v3626_v55 }
  0x21   :  { %3621 = vmatpush3.bf16.msra.mxu0 %v3618_v52 }
  0x22   :  { %3631 = vmatprep.subr.bf16.mxu0 %v3630_v58 }
  0x23   :  { %3629 = vmatpush3.bf16.msra.mxu1 %v3626_v55 }
  0x24   :  { %3389 = vmatmul.mubr.msk.f32.vlgmr.msra.gmra.mrb[6].mxu0 %vm59_vm0, %v3878_v21  ;;  %3639 = vmatprep.subr.bf16.mxu1 %v3638_v61 }
  0x25   :  { %3633 = vmatpush3.bf16.msra.mxu0 %v3630_v58  ;;  %3410 = vmatprep.mubr.msk.f32.mxu0 %vm59_vm0, %v3894_v27 }
  0x26   :  { %3635 = vmatprep.subr.bf16.mxu0 %v3634_v0  ;;  %3400 = vmatmul.mubr.msk.f32.vlgmr.msra.gmra.mrb[6].mxu1 %vm59_vm0, %v3889_v25 }
  0x27   :  { %3641 = vmatpush3.bf16.msra.mxu1 %v3638_v61  ;;  %3421 = vmatprep.mubr.msk.f32.mxu1 %vm59_vm0, %v3846_v11  ;;  %v3748_v11 = vmov 0.0  }
  0x28   :  { %3643 = vmatprep.subr.bf16.mxu1 %v3642_v3 }
  0x29   :  { %3637 = vmatpush3.bf16.msra.mxu0 %v3634_v0 }
  0x2a   :  { %3647 = vmatprep.subr.bf16.mxu0 %v3646_v4 }
  0x2b   :  { %3645 = vmatpush3.bf16.msra.mxu1 %v3642_v3 }
  0x2c   :  { %3411 = vmatmul.mubr.msk.f32.vlgmr.msra.gmra.mrb[8].mxu0 %vm59_vm0, %v3925_v36  ;;  %3655 = vmatprep.subr.bf16.mxu1 %v3654_v10 }
  0x2d   :  { %3649 = vmatpush3.bf16.msra.mxu0 %v3646_v4  ;;  %3432 = vmatprep.mubr.msk.f32.mxu0 %vm59_vm0, %v3853_v13  ;;  %v3150_v13 = vld [vmem:[%s4344_s7 + $0x78] sm:$0xff] }
  0x2e   :  { %3651 = vmatprep.subr.bf16.mxu0 %v3650_v7  ;;  %3422 = vmatmul.mubr.msk.f32.vlgmr.msra.gmra.mrb[8].mxu1 %vm59_vm0, %v3878_v21  ;;  %v3658_v14 = vpack.c.bf16 %v3150_v13, %v3149_v12 }
  0x2f   :  { %3443 = vmatprep.mubr.msk.f32.mxu1 %vm59_vm0, %v3894_v27  ;;  %3657 = vmatpush3.bf16.msra.mxu1 %v3654_v10  ;;  %v3088_v27 = vld [vmem:[%s4341_s4 + $0x1] ss:$0 sm:$0xff]  ;;  %v4128_v10 = vld [vmem:[%s4341_s4 + $0x3] ss:$0 sm:$0xff] }
  0x30   :  { %3659 = vmatprep.subr.bf16.mxu1 %v3658_v14 }
  0x31   :  { %3653 = vmatpush3.bf16.msra.mxu0 %v3650_v7 }
  0x32   :  { %3446 = vmatprep.subr.mxu0 %v3748_v11 }
  0x33   :  { %3661 = vmatpush3.bf16.msra.mxu1 %v3658_v14 }
  0x34   :  { %3433 = vmatmul.mubr.msk.f32.vlgmr.msra.gmra.mrb[10].mxu0 %vm59_vm0, %v3889_v25  ;;  %3451 = vmatprep.subr.mxu1 %v3748_v11  ;;  %v3080_v25 = vld [vmem:[%s4345_s8] ss:$0 sm:$0xff] }
  0x35   :  { %3448 = vmatprep.mubr.msk.f32.mxu0 %vm3749_vm1, %v3748_v11 }
  0x36   :  { %3444 = vmatmul.mubr.msk.f32.vlgmr.msra.gmra.mrb[10].mxu1 %vm59_vm0, %v3925_v36 }
  0x37   :  { %3453 = vmatprep.mubr.msk.f32.mxu1 %vm3749_vm1, %v3748_v11 }
  0xdf   :  { %v3324_v16 = vpop.f32.mrb[0].mxu0 }
  0xe0   :  { %v4053_v18 = vadd.f32 %v3324_v16, %v3074_v15  ;;  %v3335_v19 = vpop.f32.mrb[0].mxu1  ;;  %v132_v20 = vpop.f32.mrb[1].mxu0 }
  0xe1   :  { %v4055_v21 = vadd.f32 %v3335_v19, %v3077_v17  ;;  %v224_v22 = vpop.f32.mrb[1].mxu1  ;;  %v133_v24 = vadd.f32 %v3074_v15, %v132_v20  ;;  %v4135_v15 = vld [vmem:[%s4345_s8 + $0x3] ss:$0 sm:$0xff] }
  0xe2   :  { %v225_v23 = vadd.f32 %v3077_v17, %v224_v22 }
  0xe4   :  { %3447 = vmatpush3.xpose.msk.msra.mxu0 %vm1118_vm2, %v225_v23 }
  0xe5   :  { %3456 = vmatprep.subr.mxu0 %v3748_v11 }
  0xe7   :  { %3449 = vmatmul.mubr.msk.f32.vlgmr.msra.gmra.mrb[12].mxu0 %vm1118_vm2, %v133_v24  ;;  %v3346_v26 = vpop.f32.mrb[2].mxu0 }
  0xe8   :  { %v4066_v28 = vadd.f32 %v3346_v26, %v3080_v25  ;;  %v316_v29 = vpop.f32.mrb[3].mxu0  ;;  %3458 = vmatprep.mubr.msk.f32.mxu0 %vm3749_vm1, %v3748_v11 }
  0xe9   :  { %v317_v30 = vadd.f32 %v3080_v25, %v316_v29  ;;  %v3357_v31 = vpop.f32.mrb[2].mxu1 }
  0xea   :  { %v4070_v32 = vadd.f32 %v3357_v31, %v3088_v27  ;;  %v404_v33 = vpop.f32.mrb[3].mxu1 }
  0xeb   :  { %3452 = vmatpush3.msra.mxu1 %v317_v30  ;;  %v405_v39 = vadd.f32 %v3088_v27, %v404_v33 }
  0xec   :  { %3461 = vmatprep.subr.mxu1 %v3748_v11 }
  0xef   :  { %v3368_v35 = vpop.f32.mrb[4].mxu0 }
  0xf0   :  { %v4076_v36 = vadd.f32 %v3368_v35, %v3096_v34  ;;  %v492_v37 = vpop.f32.mrb[5].mxu0 }
  0xf1   :  { %v493_v38 = vadd.f32 %v3096_v34, %v492_v37  ;;  %v3379_v4 = vpop.f32.mrb[4].mxu1 }
  0xf2   :  { %v580_v6 = vpop.f32.mrb[5].mxu1  ;;  %v4120_v7 = vadd.f32 %v3379_v4, %v3104_v5 }
  0xf3   :  { %3457 = vmatpush3.xpose.msk.msra.mxu0 %vm1118_vm2, %v493_v38  ;;  %v581_v30 = vadd.f32 %v3104_v5, %v580_v6 }
  0xf4   :  { %3466 = vmatprep.subr.mxu0 %v3748_v11 }
  0xf6   :  { %3459 = vmatmul.mubr.msk.f32.vlgmr.msra.gmra.mrb[14].mxu0 %vm1118_vm2, %v405_v39  ;;  %v4155_v39 = vld [vmem:[%s4346_s9] sm:$0xff] }
  0xf7   :  { %v3390_v41 = vpop.f32.mrb[6].mxu0  ;;  %3468 = vmatprep.mubr.msk.f32.mxu0 %vm3749_vm1, %v3748_v11 }
  0xf8   :  { %v4089_v42 = vadd.f32 %v3390_v41, %v4083_v40  ;;  %v4091_v43 = vpop.f32.mrb[7].mxu0  ;;  %v4166_v41 = vld [vmem:[%s4346_s9 + $0x8] sm:$0xff] }
  0xf9   :  { %v3401_v8 = vpop.f32.mrb[6].mxu1  ;;  %3467 = vmatpush3.msra.mxu0 %v4166_v41 }
  0xfa   :  { %v4130_v12 = vadd.f32 %v3401_v8, %v3120_v9  ;;  %v756_v13 = vpop.f32.mrb[7].mxu1  ;;  %3476 = vmatprep.subr.mxu0 %v3748_v11 }
  0xff   :  { %v3412_v45 = vpop.f32.mrb[8].mxu0 }
 0x100   :  { %v4099_v46 = vadd.f32 %v3412_v45, %v4096_v44  ;;  %v4101_v47 = vpop.f32.mrb[9].mxu0 }
 0x101   :  { %v3423_v14 = vpop.f32.mrb[8].mxu1  ;;  %v845_v45 = vadd.f32 %v4096_v44, %v4101_v47  ;;  %v669_v44 = vadd.f32 %v4083_v40, %v4091_v43 }
 0x102   :  { %v4138_v16 = vadd.f32 %v3423_v14, %v4128_v10  ;;  %v4140_v17 = vpop.f32.mrb[9].mxu1 }
 0x103   :  { %v933_v14 = vadd.f32 %v4128_v10, %v4140_v17 }
 0x107   :  { %v3434_v49 = vpop.f32.mrb[10].mxu0 }
 0x108   :  { %v4109_v50 = vadd.f32 %v3434_v49, %v4106_v48  ;;  %v4111_v51 = vpop.f32.mrb[11].mxu0 }
 0x109   :  { %v3445_v19 = vpop.f32.mrb[10].mxu1 }
 0x10a   :  { %v4143_v20 = vadd.f32 %v3445_v19, %v4135_v15  ;;  %v4145_v22 = vpop.f32.mrb[11].mxu1 }
 0x1ba   :  { %v1191_v52 = vpop.f32.mrb[12].mxu0 }
 0x1bb   :  { %v3450_v53 = vpop.f32.mrb[13].mxu0  ;;  %v1195_v54 = vsel %vm1118_vm2, %v1191_v52, -inf }
 0x1bc   :  { %1196 = vmax.xlane.f32.xlu0 %v1195_v54  ;;  %v757_v53 = vadd.f32 %v3120_v9, %v756_v13  ;;  %v1021_v13 = vadd.f32 %v4106_v48, %v4111_v51  ;;  %v1109_v48 = vadd.f32 %v4135_v15, %v4145_v22 }
 0x1c9   :  { %v1355_v55 = vpop.f32.mrb[14].mxu0 }
 0x1ca   :  { %v3460_v56 = vpop.f32.mrb[15].mxu0  ;;  %v1359_v57 = vsel %vm1118_vm2, %v1355_v55, -inf }
 0x1cb   :  { %1360 = vmax.xlane.f32.xlu0 %v1359_v57 }
 0x249   :  { %v1197_v58 = vpop.xlane.xlu0 %1196 }
 0x24a   :  { %v1198_v59 = vsub.f32 %v1191_v52, %v1197_v58 }
 0x24c   :  { %v1199_v60 = vmul.f32 1.442695, %v1198_v59 }
 0x24e   :  { %3668 = vpow2.f32 %v1199_v60 }
 0x258   :  { %v3669_v61 = vpop.eup %3668  ;;  %v1361_v62 = vpop.xlane.xlu0 %1360 }
 0x259   :  { %v1362_v63 = vsub.f32 %v1355_v55, %v1361_v62  ;;  %v1201_v0 = vsel %vm1118_vm2, %v3669_v61, 0.0 }
 0x25a   :  { %1202 = vadd.xlane.f32.xlu1 %v1201_v0 }
 0x25b   :  { %v1363_v1 = vmul.f32 1.442695, %v1362_v63 }
 0x25d   :  { %3670 = vpow2.f32 %v1363_v1 }
 0x267   :  { %v3671_v2 = vpop.eup %3670 }
 0x268   :  { %v1365_v3 = vsel %vm1118_vm2, %v3671_v2, 0.0 }
 0x269   :  { %1366 = vadd.xlane.f32.xlu1 %v1365_v3 }
 0x2e7   :  { %v1203_v23 = vpop.xlane.xlu1 %1202 }
 0x2e8   :  { %3672 = vrcp.f32 %v1203_v23 }
 0x2f2   :  { %v3673_v24 = vpop.eup %3672 }
 0x2f3   :  { %v1205_v25 = vmul.f32 %v3673_v24, %v1203_v23 }
 0x2f5   :  { %v1206_v26 = vsub.f32 2.0, %v1205_v25 }
 0x2f6   :  { %v1367_v27 = vpop.xlane.xlu1 %1366 }
 0x2f7   :  { %v1207_v29 = vmul.f32 %v3673_v24, %v1206_v26  ;;  %3674 = vrcp.f32 %v1367_v27 }
 0x2f9   :  { %v1208_v31 = vmul.f32 %v3669_v61, %v1207_v29 }
 0x2fb   :  { %2072 = vst.msk [vmem:[#allocation4] sm:$0xff] %vm1118_vm2, %v1208_v31  ;;  %3454 = vmatmul.mubr.msk.f32.vlgmr.msra.gmra.mrb[12].mxu1 %vm1118_vm2, %v1208_v31 }
 0x2fc   :  { %3462 = vmatpush3.msra.mxu1 %v581_v30  ;;  %3463 = vmatprep.mubr.msk.f32.mxu1 %vm3749_vm1, %v3748_v11 }
 0x2fd   :  { %3471 = vmatprep.subr.mxu1 %v3748_v11 }
 0x301   :  { %v3675_v33 = vpop.eup %3674 }
 0x302   :  { %v1369_v34 = vmul.f32 %v3675_v33, %v1367_v27  ;;  %v4219_v27 = vld [vmem:[%s4346_s9 + $0x18] sm:$0xff] }
 0x304   :  { %v1370_v35 = vsub.f32 2.0, %v1369_v34 }
 0x306   :  { %v1371_v37 = vmul.f32 %v3675_v33, %v1370_v35 }
 0x308   :  { %v1372_v38 = vmul.f32 %v3671_v2, %v1371_v37  ;;  %v4191_v2 = vld [vmem:[%s4346_s9 + $0x10] sm:$0xff] }
 0x30a   :  { %2073 = vst.msk [vmem:[#allocation4 + $0x8] sm:$0xff] %vm1118_vm2, %v1372_v38  ;;  %3464 = vmatmul.mubr.msk.f32.vlgmr.msra.gmra.mrb[14].mxu1 %vm1118_vm2, %v1372_v38 }
 0x30b   :  { %3472 = vmatpush3.msra.mxu1 %v4155_v39  ;;  %3473 = vmatprep.mubr.msk.f32.mxu1 %vm3749_vm1, %v3748_v11 }
 0x30c   :  { %3481 = vmatprep.subr.mxu1 %v3748_v11 }
 0x3ce   :  { %v1278_v49 = vpop.f32.mrb[12].mxu1 }
 0x3cf   :  { %v3455_v52 = vpop.f32.mrb[13].mxu1  ;;  %3474 = vmatmul.mubr.msk.f32.vlgmr.msra.gmra.mrb[16].mxu1 %vm1118_vm2, %v1278_v49 }
 0x3d0   :  { %3482 = vmatpush3.msra.mxu1 %v845_v45  ;;  %3483 = vmatprep.mubr.msk.f32.mxu1 %vm3749_vm1, %v3748_v11 }
 0x3d1   :  { %3491 = vmatprep.subr.mxu1 %v3748_v11 }
 0x3dd   :  { %v1442_v54 = vpop.f32.mrb[14].mxu1 }
 0x3de   :  { %v3465_v55 = vpop.f32.mrb[15].mxu1  ;;  %3469 = vmatmul.mubr.msk.f32.vlgmr.msra.gmra.mrb[16].mxu0 %vm1118_vm2, %v1442_v54 }
 0x3df   :  { %3477 = vmatpush3.xpose.msk.msra.mxu0 %vm1118_vm2, %v757_v53  ;;  %3478 = vmatprep.mubr.msk.f32.mxu0 %vm3749_vm1, %v3748_v11 }
 0x3e0   :  { %3486 = vmatprep.subr.mxu0 %v3748_v11 }
 0x3e2   :  { %3479 = vmatmul.mubr.msk.f32.vlgmr.msra.gmra.mrb[18].mxu0 %vm1118_vm2, %v669_v44 }
 0x3e3   :  { %3488 = vmatprep.mubr.msk.f32.mxu0 %vm3749_vm1, %v3748_v11  ;;  %3487 = vmatpush3.msra.mxu0 %v4191_v2 }
 0x3e4   :  { %3496 = vmatprep.subr.mxu0 %v3748_v11 }
 0x4a2   :  { %v1590_v47 = vpop.f32.mrb[16].mxu1 }
 0x4a3   :  { %v3475_v56 = vpop.f32.mrb[17].mxu1 }
 0x4b1   :  { %v1517_v57 = vpop.f32.mrb[16].mxu0 }
 0x4b2   :  { %v1591_v58 = vadd.f32 %v1590_v47, %v1517_v57  ;;  %v3470_v59 = vpop.f32.mrb[17].mxu0 }
 0x4b5   :  { %v1666_v60 = vpop.f32.mrb[18].mxu0 }
 0x4b6   :  { %v3480_v61 = vpop.f32.mrb[19].mxu0  ;;  %v1670_v62 = vsel %vm1118_vm2, %v1666_v60, -inf }
 0x4b7   :  { %1671 = vmax.xlane.f32.xlu0 %v1670_v62  ;;  %v4255_v61 = vld [vmem:[%s4347_s10] ss:$0 sm:$0xff]  ;;  %s3750_s10 = smov [#allocation4]  }
 0x4b8   :  { %s3059_s13 = sshll.u32 %s3750_s10, 4  ;;  %s3060_s13 = int_to_ptr.vmem [resolvable:$true] %s3059_s13 }
 0x4b9   :  { %s3700_s14 = scalar_lea.vmem %s3060_s13, 1024  ;;  %p3705_p1 = scmp.lt.s32.totalorder %s3060_s13, %s3060_s13 }
 0x4ba   :  { %p3701_p0 = scmp.ne.s32.totalorder %s3060_s13, %s3700_s14  ;;  %p3706_p2 = scmp.lt.s32.totalorder %s3700_s14, %s3700_s14 }
 0x4bc   :  { %p3707_p3 = por %p3706_p2, %p3705_p1 }
 0x4be   :  { %p3708_p4 = pnand %p3707_p3, %p3701_p0 }
 0x544   :  { %v1672_v63 = vpop.xlane.xlu0 %1671 }
 0x545   :  { %v1673_v0 = vsub.f32 %v1666_v60, %v1672_v63 }
 0x547   :  { %v1674_v40 = vmul.f32 1.442695, %v1673_v0 }
 0x549   :  { %3676 = vpow2.f32 %v1674_v40 }
 0x553   :  { %v3677_v43 = vpop.eup %3676 }
 0x554   :  { %v1676_v1 = vsel %vm1118_vm2, %v3677_v43, 0.0 }
 0x555   :  { %1677 = vadd.xlane.f32.xlu1 %v1676_v1 }
 0x5e2   :  { %v1678_v3 = vpop.xlane.xlu1 %1677 }
 0x5e3   :  { %3678 = vrcp.f32 %v1678_v3 }
 0x5ed   :  { %v3679_v4 = vpop.eup %3678 }
 0x5ee   :  { %v1680_v5 = vmul.f32 %v3679_v4, %v1678_v3 }
 0x5f0   :  { %v1681_v6 = vsub.f32 2.0, %v1680_v5 }
 0x5f2   :  { %v1682_v8 = vmul.f32 %v3679_v4, %v1681_v6 }
 0x5f4   :  { %v1683_v9 = vmul.f32 %v3677_v43, %v1682_v8 }
 0x5f6   :  { %2074 = vst.msk [vmem:[#allocation4 + $0x10] sm:$0xff] %vm1118_vm2, %v1683_v9  ;;  %3484 = vmatmul.mubr.msk.f32.vlgmr.msra.gmra.mrb[18].mxu1 %vm1118_vm2, %v1683_v9 }
 0x5f7   :  { %3492 = vmatpush3.xpose.msk.msra.mxu1 %vm1118_vm2, %v1021_v13  ;;  %3493 = vmatprep.mubr.msk.f32.mxu1 %vm3749_vm1, %v3748_v11 }
 0x5f8   :  { %3501 = vmatprep.subr.mxu1 %v3748_v11 }
 0x5fa   :  { %3494 = vmatmul.mubr.msk.f32.vlgmr.msra.gmra.mrb[20].mxu1 %vm1118_vm2, %v933_v14 }
 0x5fb   :  { %3503 = vmatprep.mubr.msk.f32.mxu1 %vm3749_vm1, %v3748_v11  ;;  %3502 = vmatpush3.msra.mxu1 %v4219_v27 }
 0x5fc   :  { %3511 = vmatprep.subr.mxu1 %v3748_v11 }
 0x6c9   :  { %v1753_v51 = vpop.f32.mrb[18].mxu1 }
 0x6ca   :  { %v3485_v19 = vpop.f32.mrb[19].mxu1  ;;  %3489 = vmatmul.mubr.msk.f32.vlgmr.msra.gmra.mrb[20].mxu0 %vm1118_vm2, %v1753_v51 }
 0x6cb   :  { %3497 = vmatpush3.msra.mxu0 %v1109_v48  ;;  %3498 = vmatprep.mubr.msk.f32.mxu0 %vm3749_vm1, %v3748_v11 }
 0x6cc   :  { %3506 = vmatprep.subr.mxu0 %v3748_v11 }
 0x6cd   :  { %v1905_v10 = vpop.f32.mrb[20].mxu1 }
 0x6ce   :  { %v3495_v17 = vpop.f32.mrb[21].mxu1  ;;  %v1909_v23 = vsel %vm1118_vm2, %v1905_v10, -inf }
 0x6cf   :  { %1910 = vmax.xlane.f32.xlu0 %v1909_v23 }
 0x75c   :  { %v1911_v24 = vpop.xlane.xlu0 %1910 }
 0x75d   :  { %v1912_v25 = vsub.f32 %v1905_v10, %v1911_v24 }
 0x75f   :  { %v1913_v26 = vmul.f32 1.442695, %v1912_v25 }
 0x761   :  { %3680 = vpow2.f32 %v1913_v26 }
 0x76b   :  { %v3681_v15 = vpop.eup %3680 }
 0x76c   :  { %v1915_v22 = vsel %vm1118_vm2, %v3681_v15, 0.0 }
 0x76d   :  { %1916 = vadd.xlane.f32.xlu1 %v1915_v22 }
 0x79d   :  { %v1828_v29 = vpop.f32.mrb[20].mxu0 }
 0x79e   :  { %v1832_v30 = vadd.f32 %v1828_v29, %v1591_v58  ;;  %v3490_v31 = vpop.f32.mrb[21].mxu0 }
 0x7fa   :  { %v1917_v33 = vpop.xlane.xlu1 %1916 }
 0x7fb   :  { %3682 = vrcp.f32 %v1917_v33 }
 0x805   :  { %v3683_v34 = vpop.eup %3682 }
 0x806   :  { %v1919_v35 = vmul.f32 %v3683_v34, %v1917_v33 }
 0x808   :  { %v1920_v37 = vsub.f32 2.0, %v1919_v35 }
 0x80a   :  { %v1921_v38 = vmul.f32 %v3683_v34, %v1920_v37 }
 0x80c   :  { %v1922_v45 = vmul.f32 %v3681_v15, %v1921_v38 }
 0x80e   :  { %2075 = vst.msk [vmem:[#allocation4 + $0x18] sm:$0xff] %vm1118_vm2, %v1922_v45  ;;  %3499 = vmatmul.mubr.msk.f32.vlgmr.msra.gmra.mrb[22].mxu0 %vm1118_vm2, %v1922_v45 }
 0x80f   :  { %3507 = vmatpush3.xpose.msk.msra.mxu0 %vm1118_vm2, %v4055_v21  ;;  %3508 = vmatprep.mubr.msk.f32.mxu0 %vm3749_vm1, %v3748_v11 }
 0x810   :  { %3516 = vmatprep.subr.mxu0 %v3748_v11 }
 0x812   :  { %3509 = vmatmul.mubr.msk.f32.vlgmr.msra.gmra.mrb[24].mxu0 %vm1118_vm2, %v4053_v18 }
 0x813   :  { %3517 = vmatpush3.xpose.msk.msra.mxu0 %vm1118_vm2, %v4076_v36  ;;  %3518 = vmatprep.mubr.msk.f32.mxu0 %vm3749_vm1, %v3748_v11 }
 0x814   :  { %3526 = vmatprep.subr.mxu0 %v3748_v11 }
 0x816   :  { %3519 = vmatmul.mubr.msk.f32.vlgmr.msra.gmra.mrb[26].mxu0 %vm1118_vm2, %v4070_v32 }
 0x817   :  { %3527 = vmatpush3.msra.mxu0 %v4166_v41  ;;  %3528 = vmatprep.mubr.msk.f32.mxu0 %vm3749_vm1, %v3748_v11 }
 0x818   :  { %3536 = vmatprep.subr.mxu0 %v3748_v11 }
 0x8e1   :  { %v1992_v21 = vpop.f32.mrb[22].mxu0 }
 0x8e2   :  { %v3500_v18 = vpop.f32.mrb[23].mxu0  ;;  %3504 = vmatmul.mubr.msk.f32.vlgmr.msra.gmra.mrb[22].mxu1 %vm1118_vm2, %v1992_v21 }
 0x8e3   :  { %3512 = vmatpush3.msra.mxu1 %v4066_v28  ;;  %3513 = vmatprep.mubr.msk.f32.mxu1 %vm3749_vm1, %v3748_v11 }
 0x8e4   :  { %3521 = vmatprep.subr.mxu1 %v3748_v11 }
 0x8e5   :  { %v2156_v36 = vpop.f32.mrb[24].mxu0 }
 0x8e6   :  { %v3510_v32 = vpop.f32.mrb[25].mxu0  ;;  %v2160_v41 = vsel %vm1118_vm2, %v2156_v36, -inf }
 0x8e7   :  { %2161 = vmax.xlane.f32.xlu0 %v2160_v41 }
 0x8e9   :  { %v2320_v49 = vpop.f32.mrb[26].mxu0 }
 0x8ea   :  { %v3520_v52 = vpop.f32.mrb[27].mxu0  ;;  %v2324_v53 = vsel %vm1118_vm2, %v2320_v49, -inf }
 0x8eb   :  { %2325 = vmax.xlane.f32.xlu1 %v2324_v53 }
 0x974   :  { %v2162_v54 = vpop.xlane.xlu0 %2161 }
 0x975   :  { %v2163_v55 = vsub.f32 %v2156_v36, %v2162_v54 }
 0x977   :  { %v2164_v44 = vmul.f32 1.442695, %v2163_v55 }
 0x978   :  { %v2326_v47 = vpop.xlane.xlu1 %2325 }
 0x979   :  { %3684 = vpow2.f32 %v2164_v44  ;;  %v2327_v28 = vsub.f32 %v2320_v49, %v2326_v47 }
 0x97b   :  { %v2328_v56 = vmul.f32 1.442695, %v2327_v28 }
 0x97d   :  { %3686 = vpow2.f32 %v2328_v56 }
 0x983   :  { %v3685_v57 = vpop.eup %3684 }
 0x984   :  { %v2166_v58 = vsel %vm1118_vm2, %v3685_v57, 0.0 }
 0x985   :  { %2167 = vadd.xlane.f32.xlu0 %v2166_v58 }
 0x987   :  { %v3687_v59 = vpop.eup %3686 }
 0x988   :  { %v2330_v60 = vsel %vm1118_vm2, %v3687_v59, 0.0 }
 0x989   :  { %2331 = vadd.xlane.f32.xlu1 %v2330_v60 }
 0x9b5   :  { %v2067_v62 = vpop.f32.mrb[22].mxu1 }
 0x9b6   :  { %v2071_v63 = vadd.f32 %v2067_v62, %v1832_v30  ;;  %v3505_v0 = vpop.f32.mrb[23].mxu1 }
 0x9b8   :  { %v2082_v40 = vadd.f32 %v4255_v61, %v2071_v63 }
 0x9ba   :  { %2083 = vst.msk [vmem:[#allocation2] sm:$0xff] %vm59_vm0, %v2082_v40 }
 0xa12   :  { %v2168_v43 = vpop.xlane.xlu0 %2167 }
 0xa13   :  { %3688 = vrcp.f32 %v2168_v43 }
 0xa16   :  { %v2332_v1 = vpop.xlane.xlu1 %2331 }
 0xa17   :  { %3690 = vrcp.f32 %v2332_v1 }
 0xa1d   :  { %v3689_v3 = vpop.eup %3688 }
 0xa1e   :  { %v2170_v4 = vmul.f32 %v3689_v3, %v2168_v43 }
 0xa20   :  { %v2171_v5 = vsub.f32 2.0, %v2170_v4 }
 0xa21   :  { %v3691_v6 = vpop.eup %3690 }
 0xa22   :  { %v2172_v8 = vmul.f32 %v3689_v3, %v2171_v5  ;;  %v2334_v9 = vmul.f32 %v3691_v6, %v2332_v1 }
 0xa24   :  { %v2173_v13 = vmul.f32 %v3685_v57, %v2172_v8  ;;  %v2335_v14 = vsub.f32 2.0, %v2334_v9 }
 0xa26   :  { %3035 = vst.msk [vmem:[#allocation4 + $0x20] sm:$0xff] %vm1118_vm2, %v2173_v13  ;;  %v2336_v48 = vmul.f32 %v3691_v6, %v2335_v14  ;;  %3514 = vmatmul.mubr.msk.f32.vlgmr.msra.gmra.mrb[24].mxu1 %vm1118_vm2, %v2173_v13 }
 0xa27   :  { %3522 = vmatpush3.msra.mxu1 %v4120_v7  ;;  %3523 = vmatprep.mubr.msk.f32.mxu1 %vm3749_vm1, %v3748_v11 }
 0xa28   :  { %v2337_v51 = vmul.f32 %v3687_v59, %v2336_v48  ;;  %3531 = vmatprep.subr.mxu1 %v3748_v11 }
 0xa2a   :  { %3036 = vst.msk [vmem:[#allocation4 + $0x28] sm:$0xff] %vm1118_vm2, %v2337_v51  ;;  %3524 = vmatmul.mubr.msk.f32.vlgmr.msra.gmra.mrb[26].mxu1 %vm1118_vm2, %v2337_v51 }
 0xa2b   :  { %3532 = vmatpush3.msra.mxu1 %v4155_v39  ;;  %3533 = vmatprep.mubr.msk.f32.mxu1 %vm3749_vm1, %v3748_v11 }
 0xa2c   :  { %3541 = vmatprep.subr.mxu1 %v3748_v11 }
 0xaf9   :  { %v2243_v19 = vpop.f32.mrb[24].mxu1 }
 0xafa   :  { %v3515_v10 = vpop.f32.mrb[25].mxu1  ;;  %3534 = vmatmul.mubr.msk.f32.vlgmr.msra.gmra.mrb[28].mxu1 %vm1118_vm2, %v2243_v19 }
 0xafb   :  { %3542 = vmatpush3.msra.mxu1 %v4099_v46  ;;  %3543 = vmatprep.mubr.msk.f32.mxu1 %vm3749_vm1, %v3748_v11 }
 0xafc   :  { %3551 = vmatprep.subr.mxu1 %v3748_v11 }
 0xafd   :  { %v2407_v7 = vpop.f32.mrb[26].mxu1 }
 0xafe   :  { %v3525_v17 = vpop.f32.mrb[27].mxu1  ;;  %3529 = vmatmul.mubr.msk.f32.vlgmr.msra.gmra.mrb[28].mxu0 %vm1118_vm2, %v2407_v7 }
 0xaff   :  { %3537 = vmatpush3.xpose.msk.msra.mxu0 %vm1118_vm2, %v4130_v12  ;;  %3538 = vmatprep.mubr.msk.f32.mxu0 %vm3749_vm1, %v3748_v11 }
 0xb00   :  { %3546 = vmatprep.subr.mxu0 %v3748_v11 }
 0xb02   :  { %3539 = vmatmul.mubr.msk.f32.vlgmr.msra.gmra.mrb[30].mxu0 %vm1118_vm2, %v4089_v42 }
 0xb03   :  { %3547 = vmatpush3.msra.mxu0 %v4191_v2  ;;  %3548 = vmatprep.mubr.msk.f32.mxu0 %vm3749_vm1, %v3748_v11 }
 0xb04   :  { %3556 = vmatprep.subr.mxu0 %v3748_v11 }
 0xbcd   :  { %v2554_v46 = vpop.f32.mrb[28].mxu1 }
 0xbce   :  { %v3535_v39 = vpop.f32.mrb[29].mxu1 }
 0xbd1   :  { %v2481_v23 = vpop.f32.mrb[28].mxu0 }
 0xbd2   :  { %v2555_v24 = vadd.f32 %v2554_v46, %v2481_v23  ;;  %v3530_v12 = vpop.f32.mrb[29].mxu0 }
 0xbd5   :  { %v2630_v25 = vpop.f32.mrb[30].mxu0 }
 0xbd6   :  { %v3540_v26 = vpop.f32.mrb[31].mxu0  ;;  %v2634_v15 = vsel %vm1118_vm2, %v2630_v25, -inf }
 0xbd7   :  { %2635 = vmax.xlane.f32.xlu0 %v2634_v15 }
 0xc64   :  { %v2636_v22 = vpop.xlane.xlu0 %2635 }
 0xc65   :  { %v2637_v29 = vsub.f32 %v2630_v25, %v2636_v22 }
 0xc67   :  { %v2638_v42 = vmul.f32 1.442695, %v2637_v29 }
 0xc69   :  { %3692 = vpow2.f32 %v2638_v42 }
 0xc73   :  { %v3693_v2 = vpop.eup %3692 }
 0xc74   :  { %v2640_v30 = vsel %vm1118_vm2, %v3693_v2, 0.0 }
 0xc75   :  { %2641 = vadd.xlane.f32.xlu1 %v2640_v30 }
 0xd02   :  { %v2642_v31 = vpop.xlane.xlu1 %2641 }
 0xd03   :  { %3694 = vrcp.f32 %v2642_v31 }
 0xd0d   :  { %v3695_v33 = vpop.eup %3694 }
 0xd0e   :  { %v2644_v34 = vmul.f32 %v3695_v33, %v2642_v31 }
 0xd10   :  { %v2645_v35 = vsub.f32 2.0, %v2644_v34 }
 0xd12   :  { %v2646_v37 = vmul.f32 %v3695_v33, %v2645_v35 }
 0xd14   :  { %v2647_v38 = vmul.f32 %v3693_v2, %v2646_v37 }
 0xd16   :  { %3037 = vst.msk [vmem:[#allocation4 + $0x30] sm:$0xff] %vm1118_vm2, %v2647_v38  ;;  %3544 = vmatmul.mubr.msk.f32.vlgmr.msra.gmra.mrb[30].mxu1 %vm1118_vm2, %v2647_v38 }
 0xd17   :  { %3552 = vmatpush3.xpose.msk.msra.mxu1 %vm1118_vm2, %v4109_v50  ;;  %3553 = vmatprep.mubr.msk.f32.mxu1 %vm3749_vm1, %v3748_v11 }
 0xd18   :  { %3561 = vmatprep.subr.mxu1 %v3748_v11 }
 0xd1a   :  { %3554 = vmatmul.mubr.msk.f32.vlgmr.msra.gmra.mrb[32].mxu1 %vm1118_vm2, %v4138_v16 }
 0xd1b   :  { %3562 = vmatpush3.msra.mxu1 %v4219_v27  ;;  %3563 = vmatprep.mubr.msk.f32.mxu1 %vm3749_vm1, %v3748_v11 }
 0xde9   :  { %v2717_v45 = vpop.f32.mrb[30].mxu1 }
 0xdea   :  { %v3545_v21 = vpop.f32.mrb[31].mxu1  ;;  %3549 = vmatmul.mubr.msk.f32.vlgmr.msra.gmra.mrb[32].mxu0 %vm1118_vm2, %v2717_v45 }
 0xdeb   :  { %3557 = vmatpush3.msra.mxu0 %v4143_v20  ;;  %3558 = vmatprep.mubr.msk.f32.mxu0 %vm3749_vm1, %v3748_v11 }
 0xded   :  { %v2868_v50 = vpop.f32.mrb[32].mxu1 }
 0xdee   :  { %v3555_v18 = vpop.f32.mrb[33].mxu1  ;;  %v2872_v36 = vsel %vm1118_vm2, %v2868_v50, -inf }
 0xdef   :  { %2873 = vmax.xlane.f32.xlu0 %v2872_v36 }
 0xe7c   :  { %v2874_v16 = vpop.xlane.xlu0 %2873 }
 0xe7d   :  { %v2875_v32 = vsub.f32 %v2868_v50, %v2874_v16 }
 0xe7f   :  { %v2876_v27 = vmul.f32 1.442695, %v2875_v32 }
 0xe81   :  { %3696 = vpow2.f32 %v2876_v27 }
 0xe8b   :  { %v3697_v41 = vpop.eup %3696 }
 0xe8c   :  { %v2878_v49 = vsel %vm1118_vm2, %v3697_v41, 0.0 }
 0xe8d   :  { %2879 = vadd.xlane.f32.xlu1 %v2878_v49 }
 0xebd   :  { %v2791_v52 = vpop.f32.mrb[32].mxu0 }
 0xebe   :  { %v2795_v53 = vadd.f32 %v2791_v52, %v2555_v24  ;;  %v3550_v54 = vpop.f32.mrb[33].mxu0 }
 0xf1a   :  { %v2880_v20 = vpop.xlane.xlu1 %2879 }
 0xf1b   :  { %3698 = vrcp.f32 %v2880_v20 }
 0xf25   :  { %v3699_v55 = vpop.eup %3698 }
 0xf26   :  { %v2882_v11 = vmul.f32 %v3699_v55, %v2880_v20 }
 0xf28   :  { %v2883_v44 = vsub.f32 2.0, %v2882_v11 }
 0xf2a   :  { %v2884_v47 = vmul.f32 %v3699_v55, %v2883_v44 }
 0xf2c   :  { %v2885_v28 = vmul.f32 %v3697_v41, %v2884_v47 }
 0xf2e   :  { %3038 = vst.msk [vmem:[#allocation4 + $0x38] sm:$0xff] %vm1118_vm2, %v2885_v28  ;;  %3559 = vmatmul.mubr.msk.f32.vlgmr.msra.gmra.mrb[34].mxu0 %vm1118_vm2, %v2885_v28 }
0x1001   :  { %v2955_v56 = vpop.f32.mrb[34].mxu0 }
0x1002   :  { %v3560_v57 = vpop.f32.mrb[35].mxu0  ;;  %3564 = vmatmul.mubr.msk.f32.vlgmr.msra.gmra.mrb[34].mxu1 %vm1118_vm2, %v2955_v56 }
0x1003   :  { %3711 = shalt.err (!%p3708_p4)
}
0x1004   :  { %s3712_s17 = scalar_lea.hbm %s4349_s12, 1024 }
0x1005   :  { %p3713_p5 = scmp.ne.s32.totalorder %s4349_s12, %s3712_s17  ;;  %p3716_p6 = scmp.lt.u32.totalorder %s3712_s17, %s4349_s12 }
0x1007   :  { %p3718_p7 = pnand %p3716_p6, %p3713_p5 }
0x1009   :  { %3721 = shalt.err (!%p3718_p7)
}
0x100a   :  { %s3751_s21 = smov 128   ;;  %s3752_s5 = smov 8  }
0x100b   :  { %3065 = dma.vmem_to_hbm [thread:$0]  %s3060_s13, 1024, %s4349_s12, [#allocation5], %s3751_s21, %s3751_s21, %s3752_s5  }
0x100c   :  { %s3753_s24 = smov [#allocation2]  }
0x100d   :  { %s3047_s25 = sshll.u32 %s3753_s24, 4  ;;  %s3048_s25 = int_to_ptr.vmem [resolvable:$true] %s3047_s25 }
0x100e   :  { %s3722_s0 = scalar_lea.vmem %s3048_s25, 256  ;;  %p3727_p9 = scmp.lt.s32.totalorder %s3048_s25, %s3048_s25 }
0x100f   :  { %p3723_p8 = scmp.ne.s32.totalorder %s3048_s25, %s3722_s0  ;;  %p3728_p10 = scmp.lt.s32.totalorder %s3722_s0, %s3722_s0 }
0x1011   :  { %p3729_p11 = por %p3728_p10, %p3727_p9 }
0x1013   :  { %p3730_p12 = pnand %p3729_p11, %p3723_p8 }
0x10d5   :  { %v3029_v58 = vpop.f32.mrb[34].mxu1 }
0x10d6   :  { %v3033_v59 = vadd.f32 %v3029_v58, %v2795_v53  ;;  %v3565_v60 = vpop.f32.mrb[35].mxu1 }
0x10d8   :  { %v3039_v62 = vadd.f32 %v4255_v61, %v3033_v59 }
0x10da   :  { %3041 = vst.msk [vmem:[#allocation2 + $0x8] sm:$0xff] %vm59_vm0, %v3039_v62 }
0x10db   :  { %3733 = shalt.err (!%p3730_p12)
}
0x10dc   :  { %s3734_s12 = scalar_lea.hbm %s4348_s11, 256 }
0x10dd   :  { %p3735_p13 = scmp.ne.s32.totalorder %s4348_s11, %s3734_s12  ;;  %p3738_p0 = scmp.lt.u32.totalorder %s3734_s12, %s4348_s11 }
0x10df   :  { %p3740_p1 = pnand %p3738_p0, %p3735_p13 }
0x10e1   :  { %3743 = shalt.err (!%p3740_p1)
}
0x10e2   :  { %3053 = dma.vmem_to_hbm [thread:$0]  %s3048_s25, 256, %s4348_s11, [#allocation3], %s3751_s21, %s3751_s21, %s3752_s5  }
0x10e3   :  { %3744 = dma.done.wait [#allocation3], 256  }
0x10e4   :  { %3745 = vsyncadd [#allocation3], 4294967040 }
0x10e5   :  { %3746 = dma.done.wait [#allocation5], 1024  }
0x10e6   :  { %3747 = vsyncadd [#allocation5], 4294966272 }
0x10e7   :  { %3072 = vsyncpa [#allocation3], 1 }
0x10e8   :  { %3073 = vsyncpa [#allocation5], 1 }

</bundles_post_ra>
